<compile_context>
chip_gen: v7x
topology: tpu7x:2x2x1
jax: 0.10.0
libtpu: 0.0.40
codegen_flags: <defaults>
</compile_context>

<pallas_src>
import jax
import jax.numpy as jnp
from jax.experimental import pallas as pl
from jax.experimental.pallas import tpu as pltpu


def _round_up(x, m):
    return ((x + m - 1) // m) * m


# -------------------------- Pallas kernel (hot path) -------------------------

def laplace_mc_conv(pt_aug, w_flat, *, oc_pad, sb):
    """MC-sample mean/var of a 3x3 conv expressed as im2col matmuls.

    pt_aug: (Kp, M) f32 im2col patches with a ones-row (bias folded in) and
            zero rows padding Kp up to a multiple of 128.
    w_flat: (S*oc_pad, Kp) f32 sampled (weight|bias|0-pad) rows, S samples of
            oc_pad output channels each (dead channels zero-padded).
    Returns (mean, var), each (oc_pad, M) f32; var is the unbiased estimator.
    """
    Kp, M = pt_aug.shape
    SR, Kp2 = w_flat.shape
    assert Kp == Kp2
    assert SR % oc_pad == 0
    n_samples = SR // oc_pad
    assert n_samples % sb == 0
    n_steps = n_samples // sb

    def kernel(pt_ref, w_ref, mean_ref, var_ref):
        step = pl.program_id(0)

        @pl.when(step == 0)
        def _():
            mean_ref[...] = jnp.zeros_like(mean_ref)
            var_ref[...] = jnp.zeros_like(var_ref)

        # One blocked matmul for SB MC samples: (SB*oc_pad, Kp) x (Kp, M).
        y = jnp.dot(w_ref[...], pt_ref[...],
                    preferred_element_type=jnp.float32)        # (SB*oc_pad, M)
        y3 = y.reshape(sb, oc_pad, M)                           # sublane-tile view
        mean_ref[...] += jnp.sum(y3, axis=0)                    # running sum
        var_ref[...] += jnp.sum(y3 * y3, axis=0)                # running sum of squares

        @pl.when(step == n_steps - 1)
        def _():
            n = jnp.float32(n_samples)
            total = mean_ref[...]
            mean = total / n
            mean_ref[...] = mean
            # unbiased variance (matches torch.Tensor.var default, divide by n-1)
            var = (var_ref[...] - total * mean) / (n - 1.0)
            var_ref[...] = jnp.maximum(var, 0.0)

    out_shape = (jax.ShapeDtypeStruct((oc_pad, M), jnp.float32),
                 jax.ShapeDtypeStruct((oc_pad, M), jnp.float32))
    return pl.pallas_call(
        kernel,
        out_shape=out_shape,
        grid_spec=pltpu.PrefetchScalarGridSpec(
            num_scalar_prefetch=0,
            grid=(n_steps,),
            in_specs=[
                pl.BlockSpec((Kp, M), lambda s: (0, 0)),              # patches: resident
                pl.BlockSpec((sb * oc_pad, Kp), lambda s: (s, 0)),    # SB samples / step
            ],
            out_specs=[
                pl.BlockSpec((oc_pad, M), lambda s: (0, 0)),          # resident accumulators
                pl.BlockSpec((oc_pad, M), lambda s: (0, 0)),
            ],
        ),
        compiler_params=pltpu.CompilerParams(
            dimension_semantics=("arbitrary",)),                      # sample reduction
    )(pt_aug, w_flat)


# ------------------------------ plain-JAX glue --------------------------------

def feature_extractor(x, t, fe_w, fe_b):
    # TODO(synk): the full diffusion UNet backbone (feature_extractor with its
    # final conv replaced by nn.Identity) is not reproduced; this deterministic
    # 1x1-conv + time-embedding + SiLU stand-in produces features of the shape
    # that conv_out expects.
    feats = jnp.einsum('nchw,fc->nfhw', x, fe_w) + fe_b[None, :, None, None]
    temb = jnp.sin(t.astype(jnp.float32))[:, None, None, None]
    return jax.nn.silu(feats + temb)


def im2col_3x3_T(x):
    """x: (N, C, H, W) -> (C*9, N*H*W) patches for a 3x3 same-padding conv."""
    N, C, H, W = x.shape
    xp = jnp.pad(x, ((0, 0), (0, 0), (1, 1), (1, 1)))
    cols = [xp[:, :, dh:dh + H, dw:dw + W] for dh in range(3) for dw in range(3)]
    p = jnp.stack(cols, axis=2)              # (N, C, 9, H, W): index kh*3+kw
    p = p.reshape(N, C * 9, H, W)            # channel-major, matches W.reshape(OC, C*9)
    return p.transpose(1, 0, 2, 3).reshape(C * 9, N * H * W)


def _prepare(params, x, t, *, oc_keep=3, oc_pad=8, k_align=128):
    feats = feature_extractor(x, t, params["fe_w"], params["fe_b"])  # (N, Cf, H, W)
    N, Cf, H, W = feats.shape
    K = Cf * 9
    Kp = _round_up(K + 1, k_align)           # (8,128)-aligned contraction dim

    pt = im2col_3x3_T(feats)                                         # (K, M)
    M = pt.shape[1]
    ones = jnp.ones((1, M), jnp.float32)
    zpad = jnp.zeros((Kp - K - 1, M), jnp.float32)
    pt_aug = jnp.concatenate([pt.astype(jnp.float32), ones, zpad], axis=0)  # (Kp, M)

    # Only channels [:oc_keep] survive torch.split(..., 3, dim=1)[0] -> drop the
    # dead output channels before sampling, then zero-pad to oc_pad sublanes.
    w_mean = params["w_mean"][:oc_keep].reshape(oc_keep, -1)         # (3, K)
    w_std = params["w_std"][:oc_keep].reshape(oc_keep, -1)
    b_mean = params["b_mean"][:oc_keep]
    b_std = params["b_std"][:oc_keep]
    eps_w = params["eps_w"][:, :oc_keep]                             # (S, 3, K)
    eps_b = params["eps_b"][:, :oc_keep]                             # (S, 3)
    S = eps_w.shape[0]

    # diag-Laplace posterior MC samples: theta_s = mean + std * eps_s
    w_samp = w_mean[None] + w_std[None] * eps_w                      # (S, 3, K)
    b_samp = b_mean[None] + b_std[None] * eps_b                      # (S, 3)
    w_aug = jnp.concatenate([w_samp, b_samp[..., None]], axis=-1)    # (S, 3, K+1)
    w_aug = jnp.pad(w_aug, ((0, 0),
                            (0, oc_pad - oc_keep),
                            (0, Kp - (K + 1))))                      # (S, 8, Kp)
    w_flat = w_aug.reshape(S * oc_pad, Kp)                           # (S*8, Kp)

    return pt_aug, w_flat.astype(jnp.float32), (N, H, W, S)


def custom_model_forward(params, x, t, *, sb=50, oc_keep=3, oc_pad=8):
    """Equivalent of CustomModel.forward (non-CELEBA branch)."""
    pt_aug, w_flat, (N, H, W, S) = _prepare(params, x, t,
                                            oc_keep=oc_keep, oc_pad=oc_pad)
    mean_t, var_t = laplace_mc_conv(pt_aug, w_flat, oc_pad=oc_pad, sb=sb)  # (8, M)
    mean_t = mean_t[:oc_keep]                                        # live channels
    var_t = var_t[:oc_keep]
    f_mean = mean_t.reshape(oc_keep, N, H, W).transpose(1, 0, 2, 3)  # (N, 3, H, W)
    f_var = var_t.reshape(oc_keep, N, H, W).transpose(1, 0, 2, 3)
    return f_mean, f_var


def reference_forward(params, x, t):
    """Full (all 6 output channels) pure-JAX reference of the original forward."""
    feats = feature_extractor(x, t, params["fe_w"], params["fe_b"])
    N, Cf, H, W = feats.shape
    OC = params["w_mean"].shape[0]

    pt = im2col_3x3_T(feats)
    ones = jnp.ones((1, pt.shape[1]), jnp.float32)
    pt_aug = jnp.concatenate([pt, ones], axis=0)

    w_mean = params["w_mean"].reshape(OC, -1)
    w_samp = w_mean[None] + params["w_std"].reshape(1, OC, -1) * params["eps_w"]
    b_samp = params["b_mean"][None] + params["b_std"][None] * params["eps_b"]
    w_aug = jnp.concatenate([w_samp, b_samp[..., None]], axis=-1)

    fs = jnp.einsum('sok,km->som', w_aug, pt_aug)                    # (S, OC, M)
    mean_t = fs.mean(axis=0)
    var_t = fs.var(axis=0, ddof=1)
    f_mean = mean_t.reshape(OC, N, H, W).transpose(1, 0, 2, 3)
    f_var = var_t.reshape(OC, N, H, W).transpose(1, 0, 2, 3)
    return f_mean[:, :3], f_var[:, :3]                               # split(..., 3)[0]


# ----------------------------------- main -------------------------------------

if __name__ == "__main__":
    key = jax.random.PRNGKey(0)
    N, Cin, H, W = 2, 3, 16, 16          # image_size = 16
    Cf, OC, S = 8, 6, 100                # feature channels, conv_out channels, MC samples
    ks = jax.random.split(key, 8)

    x = jax.random.normal(ks[0], (N, Cin, H, W), jnp.float32)
    t = jax.random.randint(ks[1], (N,), 0, 1000)

    params = {
        # feature-extractor stand-in
        "fe_w": 0.3 * jax.random.normal(ks[2], (Cf, Cin), jnp.float32),
        "fe_b": 0.1 * jax.random.normal(ks[3], (Cf,), jnp.float32),
        # conv_out (Conv2d(Cf, OC, 3, padding=1)) posterior mean
        "w_mean": 0.1 * jax.random.normal(ks[4], (OC, Cf, 3, 3), jnp.float32),
        "b_mean": 0.05 * jax.random.normal(ks[5], (OC,), jnp.float32),
        # diag-Laplace posterior std (deterministic synthetic init; real values
        # would come from fit() on a dataloader)
        "w_std": 0.05 * jnp.ones((OC, Cf, 3, 3), jnp.float32),
        "b_std": 0.05 * jnp.ones((OC,), jnp.float32),
        # fixed MC noise for the 100 weight samples
        "eps_w": jax.random.normal(ks[6], (S, OC, Cf * 9), jnp.float32),
        "eps_b": jax.random.normal(ks[7], (S, OC), jnp.float32),
    }

    fwd = jax.jit(lambda p, xx, tt: custom_model_forward(p, xx, tt))
    f_mean, f_var = fwd(params, x, t)
    jax.block_until_ready((f_mean, f_var))
    assert f_mean.shape == (N, 3, H, W) and f_var.shape == (N, 3, H, W)

    r_mean, r_var = reference_forward(params, x, t)
    assert jnp.allclose(f_mean, r_mean, rtol=1e-3, atol=1e-4)
    assert jnp.allclose(f_var, r_var, rtol=1e-3, atol=1e-4)

    print("KERNEL_OK")
</pallas_src>

<mosaic_0001>
module attributes {stable_mosaic.version = 11 : i64} {
  func.func @kernel(%arg0: i32, %arg1: memref<128x512xf32, #tpu.memory_space<vmem>>, %arg2: memref<400x128xf32, #tpu.memory_space<vmem>>, %arg3: memref<8x512xf32, #tpu.memory_space<vmem>>, %arg4: memref<8x512xf32, #tpu.memory_space<vmem>>) attributes {dimension_semantics = [#tpu.dimension_semantics<arbitrary>], iteration_bounds = array<i64: 2>, scalar_prefetch = 0 : i64, scratch_operands = 0 : i64, tpu.core_type = #tpu.core_type<tc>, window_params = [{pipeline_mode = #tpu.pipeline_mode<synchronous>, transform_indices = @transform_0, window_bounds = array<i64: 128, 512>}, {transform_indices = @transform_1, window_bounds = array<i64: 400, 128>}, {pipeline_mode = #tpu.pipeline_mode<synchronous>, transform_indices = @transform_2, window_bounds = array<i64: 8, 512>}, {pipeline_mode = #tpu.pipeline_mode<synchronous>, transform_indices = @transform_3, window_bounds = array<i64: 8, 512>}]} {
    %c0_i32 = arith.constant 0 : i32
    %0 = arith.cmpi eq, %arg0, %c0_i32 : i32
    %1 = arith.extui %0 : i1 to i32
    %c0_i32_0 = arith.constant 0 : i32
    %2 = arith.cmpi ne, %1, %c0_i32_0 : i32
    scf.if %2 {
      %cst_15 = arith.constant 0.000000e+00 : f32
      %19 = vector.broadcast %cst_15 : f32 to vector<8x512xf32>
      %c0_16 = arith.constant 0 : index
      %c0_17 = arith.constant 0 : index
      %20 = vector.load %arg3[%c0_16, %c0_17] : memref<8x512xf32, #tpu.memory_space<vmem>>, vector<8x512xf32>
      tpu.vector_store %arg3[%c0_16, %c0_17], %19 {strides = array<i32>} : memref<8x512xf32, #tpu.memory_space<vmem>>, vector<8x512xf32>,
      %cst_18 = arith.constant 0.000000e+00 : f32
      %21 = vector.broadcast %cst_18 : f32 to vector<8x512xf32>
      %c0_19 = arith.constant 0 : index
      %c0_20 = arith.constant 0 : index
      %22 = vector.load %arg4[%c0_19, %c0_20] : memref<8x512xf32, #tpu.memory_space<vmem>>, vector<8x512xf32>
      tpu.vector_store %arg4[%c0_19, %c0_20], %21 {strides = array<i32>} : memref<8x512xf32, #tpu.memory_space<vmem>>, vector<8x512xf32>,
    } else {
    }
    %c0 = arith.constant 0 : index
    %c0_1 = arith.constant 0 : index
    %3 = vector.load %arg2[%c0, %c0_1] : memref<400x128xf32, #tpu.memory_space<vmem>>, vector<400x128xf32>
    %c0_2 = arith.constant 0 : index
    %c0_3 = arith.constant 0 : index
    %4 = vector.load %arg1[%c0_2, %c0_3] : memref<128x512xf32, #tpu.memory_space<vmem>>, vector<128x512xf32>
    %cst = arith.constant dense<0.000000e+00> : vector<400x512xf32>
    %5 = tpu.matmul %3, %4, %cst {dimension_numbers = #tpu.dot_dimension_numbers<[1], [0], [0], [1], [0, 0, 1, 1], [], []>} : vector<400x128xf32>, vector<128x512xf32>, vector<400x512xf32> -> vector<400x512xf32>
    %6 = vector.shape_cast %5 : vector<400x512xf32> to vector<50x8x512xf32>
    %c0_4 = arith.constant 0 : index
    %c0_5 = arith.constant 0 : index
    %7 = vector.load %arg3[%c0_4, %c0_5] : memref<8x512xf32, #tpu.memory_space<vmem>>, vector<8x512xf32>
    %cst_6 = arith.constant dense<0.000000e+00> : vector<8x512xf32>
    %8 = vector.multi_reduction <add>, %6, %cst_6 [0] : vector<50x8x512xf32> to vector<8x512xf32>
    %9 = arith.addf %7, %8 : vector<8x512xf32>
    %c0_7 = arith.constant 0 : index
    %c0_8 = arith.constant 0 : index
    %10 = vector.load %arg3[%c0_7, %c0_8] : memref<8x512xf32, #tpu.memory_space<vmem>>, vector<8x512xf32>
    tpu.vector_store %arg3[%c0_7, %c0_8], %9 {strides = array<i32>} : memref<8x512xf32, #tpu.memory_space<vmem>>, vector<8x512xf32>,
    %c0_9 = arith.constant 0 : index
    %c0_10 = arith.constant 0 : index
    %11 = vector.load %arg4[%c0_9, %c0_10] : memref<8x512xf32, #tpu.memory_space<vmem>>, vector<8x512xf32>
    %12 = arith.mulf %6, %6 : vector<50x8x512xf32>
    %cst_11 = arith.constant dense<0.000000e+00> : vector<8x512xf32>
    %13 = vector.multi_reduction <add>, %12, %cst_11 [0] : vector<50x8x512xf32> to vector<8x512xf32>
    %14 = arith.addf %11, %13 : vector<8x512xf32>
    %c0_12 = arith.constant 0 : index
    %c0_13 = arith.constant 0 : index
    %15 = vector.load %arg4[%c0_12, %c0_13] : memref<8x512xf32, #tpu.memory_space<vmem>>, vector<8x512xf32>
    tpu.vector_store %arg4[%c0_12, %c0_13], %14 {strides = array<i32>} : memref<8x512xf32, #tpu.memory_space<vmem>>, vector<8x512xf32>,
    %c1_i32 = arith.constant 1 : i32
    %16 = arith.cmpi eq, %arg0, %c1_i32 : i32
    %17 = arith.extui %16 : i1 to i32
    %c0_i32_14 = arith.constant 0 : i32
    %18 = arith.cmpi ne, %17, %c0_i32_14 : i32
    scf.if %18 {
      %c0_15 = arith.constant 0 : index
      %c0_16 = arith.constant 0 : index
      %19 = vector.load %arg3[%c0_15, %c0_16] : memref<8x512xf32, #tpu.memory_space<vmem>>, vector<8x512xf32>
      %cst_17 = arith.constant 1.000000e+02 : f32
      %20 = vector.broadcast %cst_17 : f32 to vector<8x512xf32>
      %21 = arith.divf %19, %20 : vector<8x512xf32>
      %c0_18 = arith.constant 0 : index
      %c0_19 = arith.constant 0 : index
      %22 = vector.load %arg3[%c0_18, %c0_19] : memref<8x512xf32, #tpu.memory_space<vmem>>, vector<8x512xf32>
      tpu.vector_store %arg3[%c0_18, %c0_19], %21 {strides = array<i32>} : memref<8x512xf32, #tpu.memory_space<vmem>>, vector<8x512xf32>,
      %c0_20 = arith.constant 0 : index
      %c0_21 = arith.constant 0 : index
      %23 = vector.load %arg4[%c0_20, %c0_21] : memref<8x512xf32, #tpu.memory_space<vmem>>, vector<8x512xf32>
      %24 = arith.mulf %19, %21 : vector<8x512xf32>
      %25 = arith.subf %23, %24 : vector<8x512xf32>
      %cst_22 = arith.constant 1.000000e+02 : f32
      %cst_23 = arith.constant 1.000000e+00 : f32
      %26 = arith.subf %cst_22, %cst_23 : f32
      %27 = vector.broadcast %26 : f32 to vector<8x512xf32>
      %28 = arith.divf %25, %27 : vector<8x512xf32>
      %cst_24 = arith.constant 0.000000e+00 : f32
      %29 = vector.broadcast %cst_24 : f32 to vector<8x512xf32>
      %30 = arith.maximumf %28, %29 : vector<8x512xf32>
      %c0_25 = arith.constant 0 : index
      %c0_26 = arith.constant 0 : index
      %31 = vector.load %arg4[%c0_25, %c0_26] : memref<8x512xf32, #tpu.memory_space<vmem>>, vector<8x512xf32>
      tpu.vector_store %arg4[%c0_25, %c0_26], %30 {strides = array<i32>} : memref<8x512xf32, #tpu.memory_space<vmem>>, vector<8x512xf32>,
    } else {
    }
    return
  }
  func.func @transform_0(%arg0: i32) -> (i32, i32) {
    %c0_i32 = arith.constant 0 : i32
    %c0_i32_0 = arith.constant 0 : i32
    %c0_i32_1 = arith.constant 0 : i32
    return %c0_i32, %c0_i32_0 : i32, i32
  }
  func.func @transform_1(%arg0: i32) -> (i32, i32) {
    %c0_i32 = arith.constant 0 : i32
    %c0_i32_0 = arith.constant 0 : i32
    return %arg0, %c0_i32 : i32, i32
  }
  func.func @transform_2(%arg0: i32) -> (i32, i32) {
    %c0_i32 = arith.constant 0 : i32
    %c0_i32_0 = arith.constant 0 : i32
    %c0_i32_1 = arith.constant 0 : i32
    return %c0_i32, %c0_i32_0 : i32, i32
  }
  func.func @transform_3(%arg0: i32) -> (i32, i32) {
    %c0_i32 = arith.constant 0 : i32
    %c0_i32_0 = arith.constant 0 : i32
    %c0_i32_1 = arith.constant 0 : i32
    return %c0_i32, %c0_i32_0 : i32, i32
  }
}

</mosaic_0001>

<bundles_post_ra>
// kernel: _lambda_.1
= control target key start
LH: loop header
LB: loop body
LE: loop exit
PB: predicated region body
PF: predicated region fallthrough
CT: control target
= control target key end

     0   :  { %s1817_s12 = smov 0   ;;  %s2300_s0 = inlined_call_operand.vmem [shape: f32[128,512], index: 0, kind: input, shape index: {}]   ;;  %s2301_s1 = inlined_call_operand.vmem [shape: f32[800,128], index: 1, kind: input, shape index: {}]   ;;  %s2302_s2 = inlined_call_operand.vmem [shape: f32[8,512], index: 2, kind: output, shape index: {0}]   ;;  %s2303_s3 = inlined_call_operand.vmem [shape: f32[8,512], index: 3, kind: output, shape index: {1}]  }
   0x1 LB: > { %s1823_s13 = sadd.s32 4294967295, %s1793_s12   ;;  %p1707_p0 = scmp.ge.s32.totalorder %s1793_s12, 1  ;;  %s1793_s12 = sphi %s1817_s12, %s14_s12  }
   0x2   : > { %p131_p1 = scmp.lt.s32.totalorder %s1793_s12, 3 }
   0x4   : > { %p132_p2 = pnand %p1707_p0, %p131_p1 }
   0x5   : > { %s150_s14 = smul.u32 (!%p132_p2), 50, %s1823_s13  ;;  %p1709_p4 = scmp.ne.s32.totalorder (!%p132_p2), %s1823_s13, 0 }
   0x6   : > { %135 = sbr.rel (%p132_p2) target bundleno = 489 (0x1e9), region = 28 }
   0x7   : > { %p151_p3 = scmp.lt.s32.totalorder (!%p132_p2), %s150_s14, 99 }
   0xd   : > { %s2305_s14 = smov (!%p151_p3, %s150_s14), 99  ;;  %159 = sbr.rel (%p1709_p4) target bundleno = 20 (0x14), region = 32 }
   0xe   : > { %s1708_s15 = sshll.u32 %s2305_s14, 3  ;;  %v1795_v0 = vmov (!%p1709_p4), 0.0  }
   0xf   : > { %s1831_s18 = scalar_lea.vmem %s2301_s1, %s1708_s15  ;;  %160 = vst [vmem:[%s2302_s2] sm:$0xff] (!%p1709_p4), %v1795_v0  ;;  %161 = vst [vmem:[%s2302_s2 + $0x8] sm:$0xff] (!%p1709_p4), %v1795_v0 }
  0x10   : > { %162 = vst [vmem:[%s2302_s2 + $0x10] sm:$0xff] (!%p1709_p4), %v1795_v0  ;;  %163 = vst [vmem:[%s2302_s2 + $0x18] sm:$0xff] (!%p1709_p4), %v1795_v0 }
  0x11   : > { %164 = vst [vmem:[%s2303_s3] sm:$0xff] (!%p1709_p4), %v1795_v0  ;;  %165 = vst [vmem:[%s2303_s3 + $0x8] sm:$0xff] (!%p1709_p4), %v1795_v0 }
  0x12   : > { %166 = vst [vmem:[%s2303_s3 + $0x10] sm:$0xff] (!%p1709_p4), %v1795_v0  ;;  %167 = vst [vmem:[%s2303_s3 + $0x18] sm:$0xff] (!%p1709_p4), %v1795_v0 }
  0x14 PF: > { %v219_v1 = vld [vmem:[%s2300_s0 + $0x8] sm:$0xff]  ;;  %v221_v3 = vld [vmem:[%s2300_s0 + $0x18] sm:$0xff]  ;;  %v218_v6 = vld [vmem:[%s2300_s0] sm:$0xff]  ;;  %v1796_v8 = vmov 0.0   ;;  %p1710_p5 = scmp.ne.s32.totalorder %s1823_s13, 1 }
  0x15   : > { %v223_v2 = vld [vmem:[%s2300_s0 + $0x28] sm:$0xff]  ;;  %v225_v5 = vld [vmem:[%s2300_s0 + $0x38] sm:$0xff]  ;;  %v222_v7 = vld [vmem:[%s2300_s0 + $0x20] sm:$0xff]  ;;  %346 = vmatprep.mubr.f32.mxu0 %v1796_v8  ;;  %711 = vmatprep.mubr.f32.mxu1 %v1796_v8 }
  0x16   : > { %v1713_v4 = vpack.c.bf16 %v223_v2, %v219_v1  ;;  %v1745_v9 = vpack.c.bf16 %v225_v5, %v221_v3  ;;  %v1715_v10 = vpack.c.bf16 %v222_v7, %v218_v6  ;;  %v220_v11 = vld [vmem:[%s2300_s0 + $0x10] sm:$0xff]  ;;  %v227_v13 = vld [vmem:[%s2300_s0 + $0x48] sm:$0xff]  ;;  %v229_v16 = vld [vmem:[%s2300_s0 + $0x58] sm:$0xff] }
  0x17   : > { %v224_v12 = vld [vmem:[%s2300_s0 + $0x30] sm:$0xff]  ;;  %v231_v15 = vld [vmem:[%s2300_s0 + $0x68] sm:$0xff]  ;;  %v233_v17 = vld [vmem:[%s2300_s0 + $0x78] sm:$0xff] }
  0x18   : > { %1714 = vmatprep.subr.bf16.mxu0 %v1713_v4  ;;  %v1747_v14 = vpack.c.bf16 %v224_v12, %v220_v11  ;;  %1746 = vmatprep.subr.bf16.mxu1 %v1745_v9  ;;  %v1717_v18 = vpack.c.bf16 %v231_v15, %v227_v13  ;;  %v1749_v19 = vpack.c.bf16 %v233_v17, %v229_v16  ;;  %v226_v20 = vld [vmem:[%s2300_s0 + $0x40] sm:$0xff]  ;;  %v228_v22 = vld [vmem:[%s2300_s0 + $0x50] sm:$0xff]  ;;  %v235_v25 = vld [vmem:[%s2300_s0 + $0x88] sm:$0xff] }
  0x19   : > { %1716 = vmatpush1.bf16.msra.mxu0 %v1715_v10  ;;  %v230_v21 = vld [vmem:[%s2300_s0 + $0x60] sm:$0xff]  ;;  %v232_v24 = vld [vmem:[%s2300_s0 + $0x70] sm:$0xff]  ;;  %v239_v26 = vld [vmem:[%s2300_s0 + $0xa8] sm:$0xff] }
  0x1a   : > { %1748 = vmatpush1.bf16.msra.mxu1 %v1747_v14  ;;  %v1719_v23 = vpack.c.bf16 %v230_v21, %v226_v20  ;;  %1718 = vmatprep.subr.bf16.mxu0 %v1717_v18  ;;  %v1751_v27 = vpack.c.bf16 %v232_v24, %v228_v22  ;;  %v1721_v28 = vpack.c.bf16 %v239_v26, %v235_v25  ;;  %v237_v29 = vld [vmem:[%s2300_s0 + $0x98] sm:$0xff]  ;;  %v234_v31 = vld [vmem:[%s2300_s0 + $0x80] sm:$0xff]  ;;  %v236_v34 = vld [vmem:[%s2300_s0 + $0x90] sm:$0xff] }
  0x1b   : > { %1750 = vmatprep.subr.bf16.mxu1 %v1749_v19  ;;  %v241_v30 = vld [vmem:[%s2300_s0 + $0xb8] sm:$0xff]  ;;  %v238_v33 = vld [vmem:[%s2300_s0 + $0xa0] sm:$0xff]  ;;  %v240_v35 = vld [vmem:[%s2300_s0 + $0xb0] sm:$0xff] }
  0x1c   : > { %v1753_v32 = vpack.c.bf16 %v241_v30, %v237_v29  ;;  %v1723_v36 = vpack.c.bf16 %v238_v33, %v234_v31  ;;  %v243_v37 = vld [vmem:[%s2300_s0 + $0xc8] sm:$0xff]  ;;  %v245_v39 = vld [vmem:[%s2300_s0 + $0xd8] sm:$0xff]  ;;  %v1755_v40 = vpack.c.bf16 %v240_v35, %v236_v34  ;;  %v242_v43 = vld [vmem:[%s2300_s0 + $0xc0] sm:$0xff] }
  0x1d   : > { %1720 = vmatpush1.bf16.msra.mxu0 %v1719_v23  ;;  %v247_v38 = vld [vmem:[%s2300_s0 + $0xe8] sm:$0xff]  ;;  %v249_v42 = vld [vmem:[%s2300_s0 + $0xf8] sm:$0xff]  ;;  %v246_v44 = vld [vmem:[%s2300_s0 + $0xe0] sm:$0xff] }
  0x1e   : > { %1752 = vmatpush1.bf16.msra.mxu1 %v1751_v27  ;;  %1722 = vmatprep.subr.bf16.mxu0 %v1721_v28  ;;  %v1725_v41 = vpack.c.bf16 %v247_v38, %v243_v37  ;;  %v1757_v45 = vpack.c.bf16 %v249_v42, %v245_v39  ;;  %v244_v46 = vld [vmem:[%s2300_s0 + $0xd0] sm:$0xff]  ;;  %v251_v48 = vld [vmem:[%s2300_s0 + $0x108] sm:$0xff]  ;;  %v253_v50 = vld [vmem:[%s2300_s0 + $0x118] sm:$0xff]  ;;  %v1727_v52 = vpack.c.bf16 %v246_v44, %v242_v43 }
  0x1f   : > { %1754 = vmatprep.subr.bf16.mxu1 %v1753_v32  ;;  %v248_v47 = vld [vmem:[%s2300_s0 + $0xf0] sm:$0xff]  ;;  %v255_v49 = vld [vmem:[%s2300_s0 + $0x128] sm:$0xff]  ;;  %v257_v51 = vld [vmem:[%s2300_s0 + $0x138] sm:$0xff] }
  0x20   : > { %v1759_v53 = vpack.c.bf16 %v248_v47, %v244_v46  ;;  %v1729_v54 = vpack.c.bf16 %v255_v49, %v251_v48  ;;  %v250_v55 = vld [vmem:[%s2300_s0 + $0x100] sm:$0xff]  ;;  %v252_v57 = vld [vmem:[%s2300_s0 + $0x110] sm:$0xff]  ;;  %v1761_v58 = vpack.c.bf16 %v257_v51, %v253_v50  ;;  %v259_v60 = vld [vmem:[%s2300_s0 + $0x148] sm:$0xff] }
  0x21   : > { %1724 = vmatpush1.bf16.msra.mxu0 %v1723_v36  ;;  %v254_v56 = vld [vmem:[%s2300_s0 + $0x120] sm:$0xff]  ;;  %v256_v59 = vld [vmem:[%s2300_s0 + $0x130] sm:$0xff]  ;;  %v263_v61 = vld [vmem:[%s2300_s0 + $0x168] sm:$0xff] }
  0x22   : > { %1756 = vmatpush1.bf16.msra.mxu1 %v1755_v40  ;;  %1726 = vmatprep.subr.bf16.mxu0 %v1725_v41  ;;  %v261_v62 = vld [vmem:[%s2300_s0 + $0x158] sm:$0xff]  ;;  %v1731_v0 = vpack.c.bf16 %v254_v56, %v250_v55  ;;  %v1763_v1 = vpack.c.bf16 %v256_v59, %v252_v57  ;;  %v1733_v2 = vpack.c.bf16 %v263_v61, %v259_v60  ;;  %v258_v3 = vld [vmem:[%s2300_s0 + $0x140] sm:$0xff]  ;;  %v260_v5 = vld [vmem:[%s2300_s0 + $0x150] sm:$0xff] }
  0x23   : > { %1758 = vmatprep.subr.bf16.mxu1 %v1757_v45  ;;  %v265_v63 = vld [vmem:[%s2300_s0 + $0x178] sm:$0xff]  ;;  %v262_v4 = vld [vmem:[%s2300_s0 + $0x160] sm:$0xff]  ;;  %v264_v7 = vld [vmem:[%s2300_s0 + $0x170] sm:$0xff] }
  0x24   : > { %v1765_v6 = vpack.c.bf16 %v265_v63, %v261_v62  ;;  %v267_v9 = vld [vmem:[%s2300_s0 + $0x188] sm:$0xff]  ;;  %v269_v11 = vld [vmem:[%s2300_s0 + $0x198] sm:$0xff]  ;;  %v1735_v13 = vpack.c.bf16 %v262_v4, %v258_v3  ;;  %v1767_v14 = vpack.c.bf16 %v264_v7, %v260_v5  ;;  %v266_v16 = vld [vmem:[%s2300_s0 + $0x180] sm:$0xff] }
  0x25   : > { %1728 = vmatpush1.bf16.msra.mxu0 %v1727_v52  ;;  %v271_v10 = vld [vmem:[%s2300_s0 + $0x1a8] sm:$0xff]  ;;  %v273_v12 = vld [vmem:[%s2300_s0 + $0x1b8] sm:$0xff]  ;;  %v270_v17 = vld [vmem:[%s2300_s0 + $0x1a0] sm:$0xff] }
  0x26   : > { %1760 = vmatpush1.bf16.msra.mxu1 %v1759_v53  ;;  %1730 = vmatprep.subr.bf16.mxu0 %v1729_v54  ;;  %v1737_v15 = vpack.c.bf16 %v271_v10, %v267_v9  ;;  %v268_v18 = vld [vmem:[%s2300_s0 + $0x190] sm:$0xff]  ;;  %v1769_v19 = vpack.c.bf16 %v273_v12, %v269_v11  ;;  %v275_v21 = vld [vmem:[%s2300_s0 + $0x1c8] sm:$0xff]  ;;  %v277_v23 = vld [vmem:[%s2300_s0 + $0x1d8] sm:$0xff]  ;;  %v1739_v25 = vpack.c.bf16 %v270_v17, %v266_v16 }
  0x27   : > { %1762 = vmatprep.subr.bf16.mxu1 %v1761_v58  ;;  %v272_v20 = vld [vmem:[%s2300_s0 + $0x1b0] sm:$0xff]  ;;  %v279_v22 = vld [vmem:[%s2300_s0 + $0x1e8] sm:$0xff]  ;;  %v281_v24 = vld [vmem:[%s2300_s0 + $0x1f8] sm:$0xff] }
  0x28   : > { %v1771_v26 = vpack.c.bf16 %v272_v20, %v268_v18  ;;  %v1741_v27 = vpack.c.bf16 %v279_v22, %v275_v21  ;;  %v274_v28 = vld [vmem:[%s2300_s0 + $0x1c0] sm:$0xff]  ;;  %v1773_v30 = vpack.c.bf16 %v281_v24, %v277_v23  ;;  %v276_v31 = vld [vmem:[%s2300_s0 + $0x1d0] sm:$0xff]  ;;  %v169_v36 = vld [vmem:[%s1831_s18 + $0x8] sm:$0xff] }
  0x29   : > { %1732 = vmatpush1.bf16.msra.mxu0 %v1731_v0  ;;  %v278_v29 = vld [vmem:[%s2300_s0 + $0x1e0] sm:$0xff]  ;;  %v280_v32 = vld [vmem:[%s2300_s0 + $0x1f0] sm:$0xff]  ;;  %v171_v38 = vld [vmem:[%s1831_s18 + $0x18] sm:$0xff] }
  0x2a   : > { %1764 = vmatpush1.bf16.msra.mxu1 %v1763_v1  ;;  %1734 = vmatprep.subr.bf16.mxu0 %v1733_v2  ;;  %v1743_v33 = vpack.c.bf16 %v278_v29, %v274_v28  ;;  %v1775_v34 = vpack.c.bf16 %v280_v32, %v276_v31  ;;  %v168_v35 = vld [vmem:[%s1831_s18] sm:$0xff]  ;;  %v170_v37 = vld [vmem:[%s1831_s18 + $0x10] sm:$0xff]  ;;  %v173_v40 = vld [vmem:[%s1831_s18 + $0x28] sm:$0xff] }
  0x2b   : > { %1766 = vmatprep.subr.bf16.mxu1 %v1765_v6  ;;  %v172_v39 = vld [vmem:[%s1831_s18 + $0x20] sm:$0xff]  ;;  %v174_v41 = vld [vmem:[%s1831_s18 + $0x30] sm:$0xff]  ;;  %v175_v42 = vld [vmem:[%s1831_s18 + $0x38] sm:$0xff] }
  0x2c   : > { %v176_v43 = vld [vmem:[%s1831_s18 + $0x40] sm:$0xff]  ;;  %v177_v44 = vld [vmem:[%s1831_s18 + $0x48] sm:$0xff]  ;;  %v178_v45 = vld [vmem:[%s1831_s18 + $0x50] sm:$0xff] }
  0x2d   : > { %1736 = vmatpush1.bf16.msra.mxu0 %v1735_v13  ;;  %v179_v46 = vld [vmem:[%s1831_s18 + $0x58] sm:$0xff]  ;;  %v180_v47 = vld [vmem:[%s1831_s18 + $0x60] sm:$0xff]  ;;  %v181_v48 = vld [vmem:[%s1831_s18 + $0x68] sm:$0xff] }
  0x2e   : > { %1768 = vmatpush1.bf16.msra.mxu1 %v1767_v14  ;;  %1738 = vmatprep.subr.bf16.mxu0 %v1737_v15  ;;  %v182_v49 = vld [vmem:[%s1831_s18 + $0x70] sm:$0xff]  ;;  %v183_v50 = vld [vmem:[%s1831_s18 + $0x78] sm:$0xff]  ;;  %v184_v51 = vld [vmem:[%s1831_s18 + $0x80] sm:$0xff] }
  0x2f   : > { %1770 = vmatprep.subr.bf16.mxu1 %v1769_v19  ;;  %v185_v52 = vld [vmem:[%s1831_s18 + $0x88] sm:$0xff]  ;;  %v186_v53 = vld [vmem:[%s1831_s18 + $0x90] sm:$0xff]  ;;  %v187_v54 = vld [vmem:[%s1831_s18 + $0x98] sm:$0xff] }
  0x30   : > { %v188_v55 = vld [vmem:[%s1831_s18 + $0xa0] sm:$0xff]  ;;  %v189_v56 = vld [vmem:[%s1831_s18 + $0xa8] sm:$0xff]  ;;  %v190_v57 = vld [vmem:[%s1831_s18 + $0xb0] sm:$0xff] }
  0x31   : > { %1740 = vmatpush1.bf16.msra.mxu0 %v1739_v25  ;;  %v191_v58 = vld [vmem:[%s1831_s18 + $0xb8] sm:$0xff]  ;;  %v192_v59 = vld [vmem:[%s1831_s18 + $0xc0] sm:$0xff]  ;;  %v193_v60 = vld [vmem:[%s1831_s18 + $0xc8] sm:$0xff] }
  0x32   : > { %1772 = vmatpush1.bf16.msra.mxu1 %v1771_v26  ;;  %1742 = vmatprep.subr.bf16.mxu0 %v1741_v27  ;;  %v194_v61 = vld [vmem:[%s1831_s18 + $0xd0] sm:$0xff]  ;;  %v195_v62 = vld [vmem:[%s1831_s18 + $0xd8] sm:$0xff]  ;;  %v196_v63 = vld [vmem:[%s1831_s18 + $0xe0] sm:$0xff] }
  0x33   : > { %1774 = vmatprep.subr.bf16.mxu1 %v1773_v30  ;;  %v197_v0 = vld [vmem:[%s1831_s18 + $0xe8] sm:$0xff]  ;;  %v198_v1 = vld [vmem:[%s1831_s18 + $0xf0] sm:$0xff]  ;;  %v199_v2 = vld [vmem:[%s1831_s18 + $0xf8] sm:$0xff] }
  0x34   : > { %v200_v3 = vld [vmem:[%s1831_s18 + $0x100] sm:$0xff]  ;;  %v201_v4 = vld [vmem:[%s1831_s18 + $0x108] sm:$0xff]  ;;  %v202_v5 = vld [vmem:[%s1831_s18 + $0x110] sm:$0xff] }
  0x35   : > { %1744 = vmatpush1.bf16.msra.mxu0 %v1743_v33  ;;  %v203_v6 = vld [vmem:[%s1831_s18 + $0x118] sm:$0xff]  ;;  %v204_v7 = vld [vmem:[%s1831_s18 + $0x120] sm:$0xff]  ;;  %v205_v9 = vld [vmem:[%s1831_s18 + $0x128] sm:$0xff] }
  0x36   : > { %1776 = vmatpush1.bf16.msra.mxu1 %v1775_v34  ;;  %v206_v10 = vld [vmem:[%s1831_s18 + $0x130] sm:$0xff]  ;;  %v207_v11 = vld [vmem:[%s1831_s18 + $0x138] sm:$0xff]  ;;  %v208_v12 = vld [vmem:[%s1831_s18 + $0x140] sm:$0xff] }
  0x37   : > { %v209_v13 = vld [vmem:[%s1831_s18 + $0x148] sm:$0xff]  ;;  %v210_v14 = vld [vmem:[%s1831_s18 + $0x150] sm:$0xff]  ;;  %v211_v15 = vld [vmem:[%s1831_s18 + $0x158] sm:$0xff] }
  0x38   : > { %347 = vmatmul.mubr.f32.vlgmr.msra.gmra.mrb[0].mxu0 %v168_v35  ;;  %v212_v16 = vld [vmem:[%s1831_s18 + $0x160] sm:$0xff]  ;;  %v213_v17 = vld [vmem:[%s1831_s18 + $0x168] sm:$0xff]  ;;  %v214_v18 = vld [vmem:[%s1831_s18 + $0x170] sm:$0xff] }
  0x39   : > { %712 = vmatmul.mubr.f32.vlgmr.msra.gmra.mrb[0].mxu1 %v168_v35  ;;  %352 = vmatprep.mubr.f32.mxu0 %v1796_v8  ;;  %v215_v19 = vld [vmem:[%s1831_s18 + $0x178] sm:$0xff]  ;;  %v216_v20 = vld [vmem:[%s1831_s18 + $0x180] sm:$0xff]  ;;  %v217_v21 = vld [vmem:[%s1831_s18 + $0x188] sm:$0xff] }
  0x3a   : > { %717 = vmatprep.mubr.f32.mxu1 %v1796_v8 }
  0x3c   : > { %353 = vmatmul.mubr.f32.gmra.mrb[2].mxu0 %v169_v36 }
  0x3d   : > { %718 = vmatmul.mubr.f32.gmra.mrb[2].mxu1 %v169_v36  ;;  %358 = vmatprep.mubr.f32.mxu0 %v1796_v8 }
  0x3e   : > { %723 = vmatprep.mubr.f32.mxu1 %v1796_v8 }
  0x40   : > { %359 = vmatmul.mubr.f32.gmra.mrb[4].mxu0 %v170_v37 }
  0x41   : > { %724 = vmatmul.mubr.f32.gmra.mrb[4].mxu1 %v170_v37  ;;  %364 = vmatprep.mubr.f32.mxu0 %v1796_v8 }
  0x42   : > { %729 = vmatprep.mubr.f32.mxu1 %v1796_v8 }
  0x44   : > { %365 = vmatmul.mubr.f32.gmra.mrb[6].mxu0 %v171_v38 }
  0x45   : > { %730 = vmatmul.mubr.f32.gmra.mrb[6].mxu1 %v171_v38  ;;  %370 = vmatprep.mubr.f32.mxu0 %v1796_v8 }
  0x46   : > { %735 = vmatprep.mubr.f32.mxu1 %v1796_v8 }
  0x48   : > { %371 = vmatmul.mubr.f32.gmra.mrb[8].mxu0 %v172_v39 }
  0x49   : > { %736 = vmatmul.mubr.f32.gmra.mrb[8].mxu1 %v172_v39  ;;  %376 = vmatprep.mubr.f32.mxu0 %v1796_v8 }
  0x4a   : > { %741 = vmatprep.mubr.f32.mxu1 %v1796_v8 }
  0x4c   : > { %377 = vmatmul.mubr.f32.gmra.mrb[10].mxu0 %v173_v40 }
  0x4d   : > { %742 = vmatmul.mubr.f32.gmra.mrb[10].mxu1 %v173_v40  ;;  %382 = vmatprep.mubr.f32.mxu0 %v1796_v8 }
  0x4e   : > { %747 = vmatprep.mubr.f32.mxu1 %v1796_v8 }
  0x50   : > { %383 = vmatmul.mubr.f32.gmra.mrb[12].mxu0 %v174_v41 }
  0x51   : > { %748 = vmatmul.mubr.f32.gmra.mrb[12].mxu1 %v174_v41  ;;  %388 = vmatprep.mubr.f32.mxu0 %v1796_v8 }
  0x52   : > { %753 = vmatprep.mubr.f32.mxu1 %v1796_v8 }
  0x54   : > { %389 = vmatmul.mubr.f32.gmra.mrb[14].mxu0 %v175_v42 }
  0x55   : > { %754 = vmatmul.mubr.f32.gmra.mrb[14].mxu1 %v175_v42  ;;  %394 = vmatprep.mubr.f32.mxu0 %v1796_v8 }
  0x56   : > { %759 = vmatprep.mubr.f32.mxu1 %v1796_v8 }
  0x58   : > { %395 = vmatmul.mubr.f32.gmra.mrb[16].mxu0 %v176_v43 }
  0x59   : > { %760 = vmatmul.mubr.f32.gmra.mrb[16].mxu1 %v176_v43  ;;  %400 = vmatprep.mubr.f32.mxu0 %v1796_v8 }
  0x5a   : > { %765 = vmatprep.mubr.f32.mxu1 %v1796_v8 }
  0x5c   : > { %401 = vmatmul.mubr.f32.gmra.mrb[18].mxu0 %v177_v44 }
  0x5d   : > { %766 = vmatmul.mubr.f32.gmra.mrb[18].mxu1 %v177_v44  ;;  %406 = vmatprep.mubr.f32.mxu0 %v1796_v8 }
  0x5e   : > { %771 = vmatprep.mubr.f32.mxu1 %v1796_v8 }
  0x60   : > { %407 = vmatmul.mubr.f32.gmra.mrb[20].mxu0 %v178_v45 }
  0x61   : > { %772 = vmatmul.mubr.f32.gmra.mrb[20].mxu1 %v178_v45  ;;  %412 = vmatprep.mubr.f32.mxu0 %v1796_v8 }
  0x62   : > { %777 = vmatprep.mubr.f32.mxu1 %v1796_v8 }
  0x64   : > { %413 = vmatmul.mubr.f32.gmra.mrb[22].mxu0 %v179_v46 }
  0x65   : > { %778 = vmatmul.mubr.f32.gmra.mrb[22].mxu1 %v179_v46  ;;  %418 = vmatprep.mubr.f32.mxu0 %v1796_v8 }
  0x66   : > { %783 = vmatprep.mubr.f32.mxu1 %v1796_v8 }
  0x68   : > { %419 = vmatmul.mubr.f32.gmra.mrb[24].mxu0 %v180_v47 }
  0x69   : > { %784 = vmatmul.mubr.f32.gmra.mrb[24].mxu1 %v180_v47  ;;  %424 = vmatprep.mubr.f32.mxu0 %v1796_v8 }
  0x6a   : > { %789 = vmatprep.mubr.f32.mxu1 %v1796_v8 }
  0x6c   : > { %425 = vmatmul.mubr.f32.gmra.mrb[26].mxu0 %v181_v48 }
  0x6d   : > { %790 = vmatmul.mubr.f32.gmra.mrb[26].mxu1 %v181_v48  ;;  %430 = vmatprep.mubr.f32.mxu0 %v1796_v8 }
  0x6e   : > { %795 = vmatprep.mubr.f32.mxu1 %v1796_v8 }
  0x70   : > { %431 = vmatmul.mubr.f32.gmra.mrb[28].mxu0 %v182_v49 }
  0x71   : > { %796 = vmatmul.mubr.f32.gmra.mrb[28].mxu1 %v182_v49  ;;  %436 = vmatprep.mubr.f32.mxu0 %v1796_v8 }
  0x72   : > { %801 = vmatprep.mubr.f32.mxu1 %v1796_v8 }
  0x74   : > { %437 = vmatmul.mubr.f32.gmra.mrb[30].mxu0 %v183_v50 }
  0x75   : > { %802 = vmatmul.mubr.f32.gmra.mrb[30].mxu1 %v183_v50  ;;  %442 = vmatprep.mubr.f32.mxu0 %v1796_v8 }
  0x76   : > { %807 = vmatprep.mubr.f32.mxu1 %v1796_v8 }
  0x78   : > { %443 = vmatmul.mubr.f32.gmra.mrb[32].mxu0 %v184_v51 }
  0x79   : > { %808 = vmatmul.mubr.f32.gmra.mrb[32].mxu1 %v184_v51  ;;  %448 = vmatprep.mubr.f32.mxu0 %v1796_v8 }
  0x7a   : > { %813 = vmatprep.mubr.f32.mxu1 %v1796_v8 }
  0x7c   : > { %449 = vmatmul.mubr.f32.gmra.mrb[34].mxu0 %v185_v52 }
  0x7d   : > { %814 = vmatmul.mubr.f32.gmra.mrb[34].mxu1 %v185_v52  ;;  %454 = vmatprep.mubr.f32.mxu0 %v1796_v8 }
  0x7e   : > { %819 = vmatprep.mubr.f32.mxu1 %v1796_v8 }
  0x80   : > { %455 = vmatmul.mubr.f32.gmra.mrb[36].mxu0 %v186_v53 }
  0x81   : > { %820 = vmatmul.mubr.f32.gmra.mrb[36].mxu1 %v186_v53  ;;  %460 = vmatprep.mubr.f32.mxu0 %v1796_v8 }
  0x82   : > { %825 = vmatprep.mubr.f32.mxu1 %v1796_v8 }
  0x84   : > { %461 = vmatmul.mubr.f32.gmra.mrb[38].mxu0 %v187_v54 }
  0x85   : > { %826 = vmatmul.mubr.f32.gmra.mrb[38].mxu1 %v187_v54  ;;  %466 = vmatprep.mubr.f32.mxu0 %v1796_v8 }
  0x86   : > { %831 = vmatprep.mubr.f32.mxu1 %v1796_v8 }
  0x88   : > { %467 = vmatmul.mubr.f32.gmra.mrb[40].mxu0 %v188_v55 }
  0x89   : > { %832 = vmatmul.mubr.f32.gmra.mrb[40].mxu1 %v188_v55  ;;  %472 = vmatprep.mubr.f32.mxu0 %v1796_v8 }
  0x8a   : > { %837 = vmatprep.mubr.f32.mxu1 %v1796_v8 }
  0x8c   : > { %473 = vmatmul.mubr.f32.gmra.mrb[42].mxu0 %v189_v56 }
  0x8d   : > { %838 = vmatmul.mubr.f32.gmra.mrb[42].mxu1 %v189_v56  ;;  %478 = vmatprep.mubr.f32.mxu0 %v1796_v8 }
  0x8e   : > { %843 = vmatprep.mubr.f32.mxu1 %v1796_v8 }
  0x90   : > { %479 = vmatmul.mubr.f32.gmra.mrb[44].mxu0 %v190_v57 }
  0x91   : > { %844 = vmatmul.mubr.f32.gmra.mrb[44].mxu1 %v190_v57  ;;  %484 = vmatprep.mubr.f32.mxu0 %v1796_v8 }
  0x92   : > { %849 = vmatprep.mubr.f32.mxu1 %v1796_v8 }
  0x94   : > { %485 = vmatmul.mubr.f32.gmra.mrb[46].mxu0 %v191_v58 }
  0x95   : > { %850 = vmatmul.mubr.f32.gmra.mrb[46].mxu1 %v191_v58  ;;  %490 = vmatprep.mubr.f32.mxu0 %v1796_v8 }
  0x96   : > { %855 = vmatprep.mubr.f32.mxu1 %v1796_v8 }
  0x98   : > { %491 = vmatmul.mubr.f32.gmra.mrb[48].mxu0 %v192_v59 }
  0x99   : > { %856 = vmatmul.mubr.f32.gmra.mrb[48].mxu1 %v192_v59  ;;  %496 = vmatprep.mubr.f32.mxu0 %v1796_v8 }
  0x9a   : > { %861 = vmatprep.mubr.f32.mxu1 %v1796_v8 }
  0x9c   : > { %497 = vmatmul.mubr.f32.gmra.mrb[50].mxu0 %v193_v60 }
  0x9d   : > { %862 = vmatmul.mubr.f32.gmra.mrb[50].mxu1 %v193_v60  ;;  %502 = vmatprep.mubr.f32.mxu0 %v1796_v8 }
  0x9e   : > { %867 = vmatprep.mubr.f32.mxu1 %v1796_v8 }
  0xa0   : > { %503 = vmatmul.mubr.f32.gmra.mrb[52].mxu0 %v194_v61 }
  0xa1   : > { %868 = vmatmul.mubr.f32.gmra.mrb[52].mxu1 %v194_v61  ;;  %508 = vmatprep.mubr.f32.mxu0 %v1796_v8 }
  0xa2   : > { %873 = vmatprep.mubr.f32.mxu1 %v1796_v8 }
  0xa4   : > { %509 = vmatmul.mubr.f32.gmra.mrb[54].mxu0 %v195_v62 }
  0xa5   : > { %874 = vmatmul.mubr.f32.gmra.mrb[54].mxu1 %v195_v62  ;;  %514 = vmatprep.mubr.f32.mxu0 %v1796_v8 }
  0xa6   : > { %879 = vmatprep.mubr.f32.mxu1 %v1796_v8 }
  0xa8   : > { %515 = vmatmul.mubr.f32.gmra.mrb[56].mxu0 %v196_v63 }
  0xa9   : > { %880 = vmatmul.mubr.f32.gmra.mrb[56].mxu1 %v196_v63  ;;  %520 = vmatprep.mubr.f32.mxu0 %v1796_v8 }
  0xaa   : > { %885 = vmatprep.mubr.f32.mxu1 %v1796_v8 }
  0xac   : > { %521 = vmatmul.mubr.f32.gmra.mrb[58].mxu0 %v197_v0 }
  0xad   : > { %886 = vmatmul.mubr.f32.gmra.mrb[58].mxu1 %v197_v0  ;;  %526 = vmatprep.mubr.f32.mxu0 %v1796_v8 }
  0xae   : > { %891 = vmatprep.mubr.f32.mxu1 %v1796_v8 }
  0xb0   : > { %527 = vmatmul.mubr.f32.gmra.mrb[60].mxu0 %v198_v1 }
  0xb1   : > { %892 = vmatmul.mubr.f32.gmra.mrb[60].mxu1 %v198_v1  ;;  %532 = vmatprep.mubr.f32.mxu0 %v1796_v8 }
  0xb2   : > { %897 = vmatprep.mubr.f32.mxu1 %v1796_v8 }
  0xb4   : > { %533 = vmatmul.mubr.f32.gmra.mrb[62].mxu0 %v199_v2 }
  0xb5   : > { %898 = vmatmul.mubr.f32.gmra.mrb[62].mxu1 %v199_v2  ;;  %538 = vmatprep.mubr.f32.mxu0 %v1796_v8 }
  0xb6   : > { %903 = vmatprep.mubr.f32.mxu1 %v1796_v8 }
  0xb8   : > { %539 = vmatmul.mubr.f32.gmra.mrb[64].mxu0 %v200_v3 }
  0xb9   : > { %904 = vmatmul.mubr.f32.gmra.mrb[64].mxu1 %v200_v3  ;;  %544 = vmatprep.mubr.f32.mxu0 %v1796_v8 }
  0xba   : > { %909 = vmatprep.mubr.f32.mxu1 %v1796_v8 }
  0xbc   : > { %545 = vmatmul.mubr.f32.gmra.mrb[66].mxu0 %v201_v4 }
  0xbd   : > { %910 = vmatmul.mubr.f32.gmra.mrb[66].mxu1 %v201_v4  ;;  %550 = vmatprep.mubr.f32.mxu0 %v1796_v8 }
  0xbe   : > { %915 = vmatprep.mubr.f32.mxu1 %v1796_v8 }
  0xc0   : > { %551 = vmatmul.mubr.f32.gmra.mrb[68].mxu0 %v202_v5 }
  0xc1   : > { %916 = vmatmul.mubr.f32.gmra.mrb[68].mxu1 %v202_v5  ;;  %556 = vmatprep.mubr.f32.mxu0 %v1796_v8 }
  0xc2   : > { %921 = vmatprep.mubr.f32.mxu1 %v1796_v8 }
  0xc4   : > { %557 = vmatmul.mubr.f32.gmra.mrb[70].mxu0 %v203_v6 }
  0xc5   : > { %922 = vmatmul.mubr.f32.gmra.mrb[70].mxu1 %v203_v6  ;;  %562 = vmatprep.mubr.f32.mxu0 %v1796_v8 }
  0xc6   : > { %927 = vmatprep.mubr.f32.mxu1 %v1796_v8 }
  0xc8   : > { %563 = vmatmul.mubr.f32.gmra.mrb[72].mxu0 %v204_v7 }
  0xc9   : > { %928 = vmatmul.mubr.f32.gmra.mrb[72].mxu1 %v204_v7  ;;  %568 = vmatprep.mubr.f32.mxu0 %v1796_v8 }
  0xca   : > { %933 = vmatprep.mubr.f32.mxu1 %v1796_v8 }
  0xcc   : > { %569 = vmatmul.mubr.f32.gmra.mrb[74].mxu0 %v205_v9 }
  0xcd   : > { %934 = vmatmul.mubr.f32.gmra.mrb[74].mxu1 %v205_v9  ;;  %574 = vmatprep.mubr.f32.mxu0 %v1796_v8 }
  0xce   : > { %939 = vmatprep.mubr.f32.mxu1 %v1796_v8 }
  0xd0   : > { %575 = vmatmul.mubr.f32.gmra.mrb[76].mxu0 %v206_v10 }
  0xd1   : > { %940 = vmatmul.mubr.f32.gmra.mrb[76].mxu1 %v206_v10  ;;  %580 = vmatprep.mubr.f32.mxu0 %v1796_v8 }
  0xd2   : > { %945 = vmatprep.mubr.f32.mxu1 %v1796_v8 }
  0xd4   : > { %581 = vmatmul.mubr.f32.gmra.mrb[78].mxu0 %v207_v11 }
  0xd5   : > { %946 = vmatmul.mubr.f32.gmra.mrb[78].mxu1 %v207_v11  ;;  %586 = vmatprep.mubr.f32.mxu0 %v1796_v8 }
  0xd6   : > { %951 = vmatprep.mubr.f32.mxu1 %v1796_v8 }
  0xd8   : > { %587 = vmatmul.mubr.f32.gmra.mrb[80].mxu0 %v208_v12 }
  0xd9   : > { %952 = vmatmul.mubr.f32.gmra.mrb[80].mxu1 %v208_v12  ;;  %592 = vmatprep.mubr.f32.mxu0 %v1796_v8 }
  0xda   : > { %957 = vmatprep.mubr.f32.mxu1 %v1796_v8 }
  0xdc   : > { %593 = vmatmul.mubr.f32.gmra.mrb[82].mxu0 %v209_v13 }
  0xdd   : > { %958 = vmatmul.mubr.f32.gmra.mrb[82].mxu1 %v209_v13  ;;  %598 = vmatprep.mubr.f32.mxu0 %v1796_v8 }
  0xde   : > { %963 = vmatprep.mubr.f32.mxu1 %v1796_v8 }
  0xe0   : > { %599 = vmatmul.mubr.f32.gmra.mrb[84].mxu0 %v210_v14 }
  0xe1   : > { %964 = vmatmul.mubr.f32.gmra.mrb[84].mxu1 %v210_v14  ;;  %604 = vmatprep.mubr.f32.mxu0 %v1796_v8 }
  0xe2   : > { %969 = vmatprep.mubr.f32.mxu1 %v1796_v8 }
  0xe4   : > { %605 = vmatmul.mubr.f32.gmra.mrb[86].mxu0 %v211_v15 }
  0xe5   : > { %970 = vmatmul.mubr.f32.gmra.mrb[86].mxu1 %v211_v15  ;;  %610 = vmatprep.mubr.f32.mxu0 %v1796_v8 }
  0xe6   : > { %975 = vmatprep.mubr.f32.mxu1 %v1796_v8 }
  0xe8   : > { %611 = vmatmul.mubr.f32.gmra.mrb[88].mxu0 %v212_v16 }
  0xe9   : > { %976 = vmatmul.mubr.f32.gmra.mrb[88].mxu1 %v212_v16  ;;  %616 = vmatprep.mubr.f32.mxu0 %v1796_v8 }
  0xea   : > { %981 = vmatprep.mubr.f32.mxu1 %v1796_v8 }
  0xec   : > { %617 = vmatmul.mubr.f32.gmra.mrb[90].mxu0 %v213_v17 }
  0xed   : > { %982 = vmatmul.mubr.f32.gmra.mrb[90].mxu1 %v213_v17  ;;  %622 = vmatprep.mubr.f32.mxu0 %v1796_v8 }
  0xee   : > { %987 = vmatprep.mubr.f32.mxu1 %v1796_v8 }
  0xf0   : > { %623 = vmatmul.mubr.f32.gmra.mrb[92].mxu0 %v214_v18 }
  0xf1   : > { %988 = vmatmul.mubr.f32.gmra.mrb[92].mxu1 %v214_v18  ;;  %628 = vmatprep.mubr.f32.mxu0 %v1796_v8 }
  0xf2   : > { %993 = vmatprep.mubr.f32.mxu1 %v1796_v8 }
  0xf4   : > { %629 = vmatmul.mubr.f32.gmra.mrb[94].mxu0 %v215_v19 }
  0xf5   : > { %994 = vmatmul.mubr.f32.gmra.mrb[94].mxu1 %v215_v19  ;;  %634 = vmatprep.mubr.f32.mxu0 %v1796_v8 }
  0xf6   : > { %999 = vmatprep.mubr.f32.mxu1 %v1796_v8 }
  0xf8   : > { %635 = vmatmul.mubr.f32.gmra.mrb[96].mxu0 %v216_v20 }
  0xf9   : > { %1000 = vmatmul.mubr.f32.gmra.mrb[96].mxu1 %v216_v20  ;;  %640 = vmatprep.mubr.f32.mxu0 %v1796_v8 }
  0xfa   : > { %1005 = vmatprep.mubr.f32.mxu1 %v1796_v8 }
  0xfc   : > { %641 = vmatmul.mubr.f32.gmra.mrb[98].mxu0 %v217_v21 }
  0xfd   : > { %1006 = vmatmul.mubr.f32.gmra.mrb[98].mxu1 %v217_v21 }
 0x10b   : > { %v348_v22 = vpop.f32.mrb[0].mxu0 }
 0x10c   : > { %v713_v23 = vpop.f32.mrb[0].mxu1  ;;  %v350_v24 = vpop.f32.mrb[1].mxu0  ;;  %v1224_v26 = vmul.f32 %v348_v22, %v348_v22 }
 0x10d   : > { %v715_v25 = vpop.f32.mrb[1].mxu1  ;;  %v1226_v28 = vmul.f32 %v713_v23, %v713_v23  ;;  %v1225_v29 = vmul.f32 %v350_v24, %v350_v24 }
 0x10e   : > { %v1227_v8 = vmul.f32 %v715_v25, %v715_v25 }
 0x10f   : > { %v354_v27 = vpop.f32.mrb[2].mxu0 }
 0x110   : > { %v1016_v30 = vadd.f32 %v354_v27, %v348_v22  ;;  %v1228_v31 = vmul.f32 %v354_v27, %v354_v27  ;;  %v719_v32 = vpop.f32.mrb[2].mxu1  ;;  %v356_v33 = vpop.f32.mrb[3].mxu0 }
 0x111   : > { %v1114_v34 = vadd.f32 %v719_v32, %v713_v23  ;;  %v1230_v35 = vmul.f32 %v719_v32, %v719_v32  ;;  %v1065_v36 = vadd.f32 %v356_v33, %v350_v24  ;;  %v1229_v37 = vmul.f32 %v356_v33, %v356_v33  ;;  %v721_v38 = vpop.f32.mrb[3].mxu1 }
 0x112   : > { %v1424_v39 = vadd.f32 %v1228_v31, %v1224_v26  ;;  %v1163_v40 = vadd.f32 %v721_v38, %v715_v25  ;;  %v1231_v41 = vmul.f32 %v721_v38, %v721_v38 }
 0x113   : > { %v1522_v42 = vadd.f32 %v1230_v35, %v1226_v28  ;;  %v1473_v43 = vadd.f32 %v1229_v37, %v1225_v29  ;;  %v360_v44 = vpop.f32.mrb[4].mxu0 }
 0x114   : > { %v1571_v45 = vadd.f32 %v1231_v41, %v1227_v8  ;;  %v1017_v46 = vadd.f32 %v1016_v30, %v360_v44  ;;  %v1232_v47 = vmul.f32 %v360_v44, %v360_v44  ;;  %v725_v48 = vpop.f32.mrb[4].mxu1  ;;  %v362_v49 = vpop.f32.mrb[5].mxu0 }
 0x115   : > { %v1115_v50 = vadd.f32 %v1114_v34, %v725_v48  ;;  %v1234_v51 = vmul.f32 %v725_v48, %v725_v48  ;;  %v1066_v52 = vadd.f32 %v1065_v36, %v362_v49  ;;  %v1233_v53 = vmul.f32 %v362_v49, %v362_v49  ;;  %v727_v54 = vpop.f32.mrb[5].mxu1 }
 0x116   : > { %v1425_v55 = vadd.f32 %v1424_v39, %v1232_v47  ;;  %v1164_v56 = vadd.f32 %v1163_v40, %v727_v54  ;;  %v1235_v57 = vmul.f32 %v727_v54, %v727_v54 }
 0x117   : > { %v1523_v58 = vadd.f32 %v1522_v42, %v1234_v51  ;;  %v1474_v59 = vadd.f32 %v1473_v43, %v1233_v53  ;;  %v366_v60 = vpop.f32.mrb[6].mxu0 }
 0x118   : > { %v1572_v61 = vadd.f32 %v1571_v45, %v1235_v57  ;;  %v1018_v62 = vadd.f32 %v1017_v46, %v366_v60  ;;  %v1236_v63 = vmul.f32 %v366_v60, %v366_v60  ;;  %v731_v0 = vpop.f32.mrb[6].mxu1  ;;  %v368_v1 = vpop.f32.mrb[7].mxu0 }
 0x119   : > { %v1116_v2 = vadd.f32 %v1115_v50, %v731_v0  ;;  %v1238_v3 = vmul.f32 %v731_v0, %v731_v0  ;;  %v1067_v4 = vadd.f32 %v1066_v52, %v368_v1  ;;  %v1237_v5 = vmul.f32 %v368_v1, %v368_v1  ;;  %v733_v6 = vpop.f32.mrb[7].mxu1 }
 0x11a   : > { %v1426_v7 = vadd.f32 %v1425_v55, %v1236_v63  ;;  %v1165_v9 = vadd.f32 %v1164_v56, %v733_v6  ;;  %v1239_v10 = vmul.f32 %v733_v6, %v733_v6 }
 0x11b   : > { %v1524_v11 = vadd.f32 %v1523_v58, %v1238_v3  ;;  %v1475_v12 = vadd.f32 %v1474_v59, %v1237_v5  ;;  %v372_v13 = vpop.f32.mrb[8].mxu0 }
 0x11c   : > { %v1573_v14 = vadd.f32 %v1572_v61, %v1239_v10  ;;  %v1019_v15 = vadd.f32 %v1018_v62, %v372_v13  ;;  %v1240_v16 = vmul.f32 %v372_v13, %v372_v13  ;;  %v737_v17 = vpop.f32.mrb[8].mxu1  ;;  %v374_v18 = vpop.f32.mrb[9].mxu0 }
 0x11d   : > { %v1117_v19 = vadd.f32 %v1116_v2, %v737_v17  ;;  %v1242_v20 = vmul.f32 %v737_v17, %v737_v17  ;;  %v1068_v21 = vadd.f32 %v1067_v4, %v374_v18  ;;  %v1241_v22 = vmul.f32 %v374_v18, %v374_v18  ;;  %v739_v23 = vpop.f32.mrb[9].mxu1 }
 0x11e   : > { %v1427_v24 = vadd.f32 %v1426_v7, %v1240_v16  ;;  %v1166_v25 = vadd.f32 %v1165_v9, %v739_v23  ;;  %v1243_v26 = vmul.f32 %v739_v23, %v739_v23 }
 0x11f   : > { %v1525_v27 = vadd.f32 %v1524_v11, %v1242_v20  ;;  %v1476_v28 = vadd.f32 %v1475_v12, %v1241_v22  ;;  %v378_v29 = vpop.f32.mrb[10].mxu0 }
 0x120   : > { %v1574_v30 = vadd.f32 %v1573_v14, %v1243_v26  ;;  %v1020_v31 = vadd.f32 %v1019_v15, %v378_v29  ;;  %v1244_v32 = vmul.f32 %v378_v29, %v378_v29  ;;  %v743_v33 = vpop.f32.mrb[10].mxu1  ;;  %v380_v34 = vpop.f32.mrb[11].mxu0 }
 0x121   : > { %v1118_v35 = vadd.f32 %v1117_v19, %v743_v33  ;;  %v1246_v36 = vmul.f32 %v743_v33, %v743_v33  ;;  %v1069_v37 = vadd.f32 %v1068_v21, %v380_v34  ;;  %v1245_v38 = vmul.f32 %v380_v34, %v380_v34  ;;  %v745_v8 = vpop.f32.mrb[11].mxu1 }
 0x122   : > { %v1428_v39 = vadd.f32 %v1427_v24, %v1244_v32  ;;  %v1167_v40 = vadd.f32 %v1166_v25, %v745_v8  ;;  %v1247_v41 = vmul.f32 %v745_v8, %v745_v8 }
 0x123   : > { %v1526_v42 = vadd.f32 %v1525_v27, %v1246_v36  ;;  %v1477_v43 = vadd.f32 %v1476_v28, %v1245_v38  ;;  %v384_v44 = vpop.f32.mrb[12].mxu0 }
 0x124   : > { %v1575_v45 = vadd.f32 %v1574_v30, %v1247_v41  ;;  %v1021_v46 = vadd.f32 %v1020_v31, %v384_v44  ;;  %v1248_v47 = vmul.f32 %v384_v44, %v384_v44  ;;  %v749_v48 = vpop.f32.mrb[12].mxu1  ;;  %v386_v49 = vpop.f32.mrb[13].mxu0 }
 0x125   : > { %v1119_v50 = vadd.f32 %v1118_v35, %v749_v48  ;;  %v1250_v51 = vmul.f32 %v749_v48, %v749_v48  ;;  %v1070_v52 = vadd.f32 %v1069_v37, %v386_v49  ;;  %v1249_v53 = vmul.f32 %v386_v49, %v386_v49  ;;  %v751_v54 = vpop.f32.mrb[13].mxu1 }
 0x126   : > { %v1429_v55 = vadd.f32 %v1428_v39, %v1248_v47  ;;  %v1168_v56 = vadd.f32 %v1167_v40, %v751_v54  ;;  %v1251_v57 = vmul.f32 %v751_v54, %v751_v54 }
 0x127   : > { %v1527_v58 = vadd.f32 %v1526_v42, %v1250_v51  ;;  %v1478_v59 = vadd.f32 %v1477_v43, %v1249_v53  ;;  %v390_v60 = vpop.f32.mrb[14].mxu0 }
 0x128   : > { %v1576_v61 = vadd.f32 %v1575_v45, %v1251_v57  ;;  %v1022_v62 = vadd.f32 %v1021_v46, %v390_v60  ;;  %v1252_v63 = vmul.f32 %v390_v60, %v390_v60  ;;  %v755_v0 = vpop.f32.mrb[14].mxu1  ;;  %v392_v1 = vpop.f32.mrb[15].mxu0 }
 0x129   : > { %v1120_v2 = vadd.f32 %v1119_v50, %v755_v0  ;;  %v1254_v3 = vmul.f32 %v755_v0, %v755_v0  ;;  %v1071_v4 = vadd.f32 %v1070_v52, %v392_v1  ;;  %v1253_v5 = vmul.f32 %v392_v1, %v392_v1  ;;  %v757_v6 = vpop.f32.mrb[15].mxu1 }
 0x12a   : > { %v1430_v7 = vadd.f32 %v1429_v55, %v1252_v63  ;;  %v1169_v9 = vadd.f32 %v1168_v56, %v757_v6  ;;  %v1255_v10 = vmul.f32 %v757_v6, %v757_v6 }
 0x12b   : > { %v1528_v11 = vadd.f32 %v1527_v58, %v1254_v3  ;;  %v1479_v12 = vadd.f32 %v1478_v59, %v1253_v5  ;;  %v396_v13 = vpop.f32.mrb[16].mxu0 }
 0x12c   : > { %v1577_v14 = vadd.f32 %v1576_v61, %v1255_v10  ;;  %v1023_v15 = vadd.f32 %v1022_v62, %v396_v13  ;;  %v1256_v16 = vmul.f32 %v396_v13, %v396_v13  ;;  %v761_v17 = vpop.f32.mrb[16].mxu1  ;;  %v398_v18 = vpop.f32.mrb[17].mxu0 }
 0x12d   : > { %v1121_v19 = vadd.f32 %v1120_v2, %v761_v17  ;;  %v1258_v20 = vmul.f32 %v761_v17, %v761_v17  ;;  %v1072_v21 = vadd.f32 %v1071_v4, %v398_v18  ;;  %v1257_v22 = vmul.f32 %v398_v18, %v398_v18  ;;  %v763_v23 = vpop.f32.mrb[17].mxu1 }
 0x12e   : > { %v1431_v24 = vadd.f32 %v1430_v7, %v1256_v16  ;;  %v1170_v25 = vadd.f32 %v1169_v9, %v763_v23  ;;  %v1259_v26 = vmul.f32 %v763_v23, %v763_v23 }
 0x12f   : > { %v1529_v27 = vadd.f32 %v1528_v11, %v1258_v20  ;;  %v1480_v28 = vadd.f32 %v1479_v12, %v1257_v22  ;;  %v402_v29 = vpop.f32.mrb[18].mxu0 }
 0x130   : > { %v1578_v30 = vadd.f32 %v1577_v14, %v1259_v26  ;;  %v1024_v31 = vadd.f32 %v1023_v15, %v402_v29  ;;  %v1260_v32 = vmul.f32 %v402_v29, %v402_v29  ;;  %v767_v33 = vpop.f32.mrb[18].mxu1  ;;  %v404_v34 = vpop.f32.mrb[19].mxu0 }
 0x131   : > { %v1122_v35 = vadd.f32 %v1121_v19, %v767_v33  ;;  %v1262_v36 = vmul.f32 %v767_v33, %v767_v33  ;;  %v1073_v37 = vadd.f32 %v1072_v21, %v404_v34  ;;  %v1261_v38 = vmul.f32 %v404_v34, %v404_v34  ;;  %v769_v8 = vpop.f32.mrb[19].mxu1 }
 0x132   : > { %v1432_v39 = vadd.f32 %v1431_v24, %v1260_v32  ;;  %v1171_v40 = vadd.f32 %v1170_v25, %v769_v8  ;;  %v1263_v41 = vmul.f32 %v769_v8, %v769_v8 }
 0x133   : > { %v1530_v42 = vadd.f32 %v1529_v27, %v1262_v36  ;;  %v1481_v43 = vadd.f32 %v1480_v28, %v1261_v38  ;;  %v408_v44 = vpop.f32.mrb[20].mxu0 }
 0x134   : > { %v1579_v45 = vadd.f32 %v1578_v30, %v1263_v41  ;;  %v1025_v46 = vadd.f32 %v1024_v31, %v408_v44  ;;  %v1264_v47 = vmul.f32 %v408_v44, %v408_v44  ;;  %v773_v48 = vpop.f32.mrb[20].mxu1  ;;  %v410_v49 = vpop.f32.mrb[21].mxu0 }
 0x135   : > { %v1123_v50 = vadd.f32 %v1122_v35, %v773_v48  ;;  %v1266_v51 = vmul.f32 %v773_v48, %v773_v48  ;;  %v1074_v52 = vadd.f32 %v1073_v37, %v410_v49  ;;  %v1265_v53 = vmul.f32 %v410_v49, %v410_v49  ;;  %v775_v54 = vpop.f32.mrb[21].mxu1 }
 0x136   : > { %v1433_v55 = vadd.f32 %v1432_v39, %v1264_v47  ;;  %v1172_v56 = vadd.f32 %v1171_v40, %v775_v54  ;;  %v1267_v57 = vmul.f32 %v775_v54, %v775_v54 }
 0x137   : > { %v1531_v58 = vadd.f32 %v1530_v42, %v1266_v51  ;;  %v1482_v59 = vadd.f32 %v1481_v43, %v1265_v53  ;;  %v414_v60 = vpop.f32.mrb[22].mxu0 }
 0x138   : > { %v1580_v61 = vadd.f32 %v1579_v45, %v1267_v57  ;;  %v1026_v62 = vadd.f32 %v1025_v46, %v414_v60  ;;  %v1268_v63 = vmul.f32 %v414_v60, %v414_v60  ;;  %v779_v0 = vpop.f32.mrb[22].mxu1  ;;  %v416_v1 = vpop.f32.mrb[23].mxu0 }
 0x139   : > { %v1124_v2 = vadd.f32 %v1123_v50, %v779_v0  ;;  %v1270_v3 = vmul.f32 %v779_v0, %v779_v0  ;;  %v1075_v4 = vadd.f32 %v1074_v52, %v416_v1  ;;  %v1269_v5 = vmul.f32 %v416_v1, %v416_v1  ;;  %v781_v6 = vpop.f32.mrb[23].mxu1 }
 0x13a   : > { %v1434_v7 = vadd.f32 %v1433_v55, %v1268_v63  ;;  %v1173_v9 = vadd.f32 %v1172_v56, %v781_v6  ;;  %v1271_v10 = vmul.f32 %v781_v6, %v781_v6 }
 0x13b   : > { %v1532_v11 = vadd.f32 %v1531_v58, %v1270_v3  ;;  %v1483_v12 = vadd.f32 %v1482_v59, %v1269_v5  ;;  %v420_v13 = vpop.f32.mrb[24].mxu0 }
 0x13c   : > { %v1581_v14 = vadd.f32 %v1580_v61, %v1271_v10  ;;  %v1027_v15 = vadd.f32 %v1026_v62, %v420_v13  ;;  %v1272_v16 = vmul.f32 %v420_v13, %v420_v13  ;;  %v785_v17 = vpop.f32.mrb[24].mxu1  ;;  %v422_v18 = vpop.f32.mrb[25].mxu0 }
 0x13d   : > { %v1125_v19 = vadd.f32 %v1124_v2, %v785_v17  ;;  %v1274_v20 = vmul.f32 %v785_v17, %v785_v17  ;;  %v1076_v21 = vadd.f32 %v1075_v4, %v422_v18  ;;  %v1273_v22 = vmul.f32 %v422_v18, %v422_v18  ;;  %v787_v23 = vpop.f32.mrb[25].mxu1 }
 0x13e   : > { %v1435_v24 = vadd.f32 %v1434_v7, %v1272_v16  ;;  %v1174_v25 = vadd.f32 %v1173_v9, %v787_v23  ;;  %v1275_v26 = vmul.f32 %v787_v23, %v787_v23 }
 0x13f   : > { %v1533_v27 = vadd.f32 %v1532_v11, %v1274_v20  ;;  %v1484_v28 = vadd.f32 %v1483_v12, %v1273_v22  ;;  %v426_v29 = vpop.f32.mrb[26].mxu0 }
 0x140   : > { %v1582_v30 = vadd.f32 %v1581_v14, %v1275_v26  ;;  %v1028_v31 = vadd.f32 %v1027_v15, %v426_v29  ;;  %v1276_v32 = vmul.f32 %v426_v29, %v426_v29  ;;  %v791_v33 = vpop.f32.mrb[26].mxu1  ;;  %v428_v34 = vpop.f32.mrb[27].mxu0 }
 0x141   : > { %v1126_v35 = vadd.f32 %v1125_v19, %v791_v33  ;;  %v1278_v36 = vmul.f32 %v791_v33, %v791_v33  ;;  %v1077_v37 = vadd.f32 %v1076_v21, %v428_v34  ;;  %v1277_v38 = vmul.f32 %v428_v34, %v428_v34  ;;  %v793_v8 = vpop.f32.mrb[27].mxu1 }
 0x142   : > { %v1436_v39 = vadd.f32 %v1435_v24, %v1276_v32  ;;  %v1175_v40 = vadd.f32 %v1174_v25, %v793_v8  ;;  %v1279_v41 = vmul.f32 %v793_v8, %v793_v8 }
 0x143   : > { %v1534_v42 = vadd.f32 %v1533_v27, %v1278_v36  ;;  %v1485_v43 = vadd.f32 %v1484_v28, %v1277_v38  ;;  %v432_v44 = vpop.f32.mrb[28].mxu0 }
 0x144   : > { %v1583_v45 = vadd.f32 %v1582_v30, %v1279_v41  ;;  %v1029_v46 = vadd.f32 %v1028_v31, %v432_v44  ;;  %v1280_v47 = vmul.f32 %v432_v44, %v432_v44  ;;  %v797_v48 = vpop.f32.mrb[28].mxu1  ;;  %v434_v49 = vpop.f32.mrb[29].mxu0 }
 0x145   : > { %v1127_v50 = vadd.f32 %v1126_v35, %v797_v48  ;;  %v1282_v51 = vmul.f32 %v797_v48, %v797_v48  ;;  %v1078_v52 = vadd.f32 %v1077_v37, %v434_v49  ;;  %v1281_v53 = vmul.f32 %v434_v49, %v434_v49  ;;  %v799_v54 = vpop.f32.mrb[29].mxu1 }
 0x146   : > { %v1437_v55 = vadd.f32 %v1436_v39, %v1280_v47  ;;  %v1176_v56 = vadd.f32 %v1175_v40, %v799_v54  ;;  %v1283_v57 = vmul.f32 %v799_v54, %v799_v54 }
 0x147   : > { %v1535_v58 = vadd.f32 %v1534_v42, %v1282_v51  ;;  %v1486_v59 = vadd.f32 %v1485_v43, %v1281_v53  ;;  %v438_v60 = vpop.f32.mrb[30].mxu0 }
 0x148   : > { %v1584_v61 = vadd.f32 %v1583_v45, %v1283_v57  ;;  %v1030_v62 = vadd.f32 %v1029_v46, %v438_v60  ;;  %v1284_v63 = vmul.f32 %v438_v60, %v438_v60  ;;  %v803_v0 = vpop.f32.mrb[30].mxu1  ;;  %v440_v1 = vpop.f32.mrb[31].mxu0 }
 0x149   : > { %v1128_v2 = vadd.f32 %v1127_v50, %v803_v0  ;;  %v1286_v3 = vmul.f32 %v803_v0, %v803_v0  ;;  %v1079_v4 = vadd.f32 %v1078_v52, %v440_v1  ;;  %v1285_v5 = vmul.f32 %v440_v1, %v440_v1  ;;  %v805_v6 = vpop.f32.mrb[31].mxu1 }
 0x14a   : > { %v1438_v7 = vadd.f32 %v1437_v55, %v1284_v63  ;;  %v1177_v9 = vadd.f32 %v1176_v56, %v805_v6  ;;  %v1287_v10 = vmul.f32 %v805_v6, %v805_v6 }
 0x14b   : > { %v1536_v11 = vadd.f32 %v1535_v58, %v1286_v3  ;;  %v1487_v12 = vadd.f32 %v1486_v59, %v1285_v5  ;;  %v444_v13 = vpop.f32.mrb[32].mxu0 }
 0x14c   : > { %v1585_v14 = vadd.f32 %v1584_v61, %v1287_v10  ;;  %v1031_v15 = vadd.f32 %v1030_v62, %v444_v13  ;;  %v1288_v16 = vmul.f32 %v444_v13, %v444_v13  ;;  %v809_v17 = vpop.f32.mrb[32].mxu1  ;;  %v446_v18 = vpop.f32.mrb[33].mxu0 }
 0x14d   : > { %v1129_v19 = vadd.f32 %v1128_v2, %v809_v17  ;;  %v1290_v20 = vmul.f32 %v809_v17, %v809_v17  ;;  %v1080_v21 = vadd.f32 %v1079_v4, %v446_v18  ;;  %v1289_v22 = vmul.f32 %v446_v18, %v446_v18  ;;  %v811_v23 = vpop.f32.mrb[33].mxu1 }
 0x14e   : > { %v1439_v24 = vadd.f32 %v1438_v7, %v1288_v16  ;;  %v1178_v25 = vadd.f32 %v1177_v9, %v811_v23  ;;  %v1291_v26 = vmul.f32 %v811_v23, %v811_v23 }
 0x14f   : > { %v1537_v27 = vadd.f32 %v1536_v11, %v1290_v20  ;;  %v1488_v28 = vadd.f32 %v1487_v12, %v1289_v22  ;;  %v450_v29 = vpop.f32.mrb[34].mxu0 }
 0x150   : > { %v1586_v30 = vadd.f32 %v1585_v14, %v1291_v26  ;;  %v1032_v31 = vadd.f32 %v1031_v15, %v450_v29  ;;  %v1292_v32 = vmul.f32 %v450_v29, %v450_v29  ;;  %v815_v33 = vpop.f32.mrb[34].mxu1  ;;  %v452_v34 = vpop.f32.mrb[35].mxu0 }
 0x151   : > { %v1130_v35 = vadd.f32 %v1129_v19, %v815_v33  ;;  %v1294_v36 = vmul.f32 %v815_v33, %v815_v33  ;;  %v1081_v37 = vadd.f32 %v1080_v21, %v452_v34  ;;  %v1293_v38 = vmul.f32 %v452_v34, %v452_v34  ;;  %v817_v8 = vpop.f32.mrb[35].mxu1 }
 0x152   : > { %v1440_v39 = vadd.f32 %v1439_v24, %v1292_v32  ;;  %v1179_v40 = vadd.f32 %v1178_v25, %v817_v8  ;;  %v1295_v41 = vmul.f32 %v817_v8, %v817_v8 }
 0x153   : > { %v1538_v42 = vadd.f32 %v1537_v27, %v1294_v36  ;;  %v1489_v43 = vadd.f32 %v1488_v28, %v1293_v38  ;;  %v456_v44 = vpop.f32.mrb[36].mxu0 }
 0x154   : > { %v1587_v45 = vadd.f32 %v1586_v30, %v1295_v41  ;;  %v1033_v46 = vadd.f32 %v1032_v31, %v456_v44  ;;  %v1296_v47 = vmul.f32 %v456_v44, %v456_v44  ;;  %v821_v48 = vpop.f32.mrb[36].mxu1  ;;  %v458_v49 = vpop.f32.mrb[37].mxu0 }
 0x155   : > { %v1131_v50 = vadd.f32 %v1130_v35, %v821_v48  ;;  %v1298_v51 = vmul.f32 %v821_v48, %v821_v48  ;;  %v1082_v52 = vadd.f32 %v1081_v37, %v458_v49  ;;  %v1297_v53 = vmul.f32 %v458_v49, %v458_v49  ;;  %v823_v54 = vpop.f32.mrb[37].mxu1 }
 0x156   : > { %v1441_v55 = vadd.f32 %v1440_v39, %v1296_v47  ;;  %v1180_v56 = vadd.f32 %v1179_v40, %v823_v54  ;;  %v1299_v57 = vmul.f32 %v823_v54, %v823_v54 }
 0x157   : > { %v1539_v58 = vadd.f32 %v1538_v42, %v1298_v51  ;;  %v1490_v59 = vadd.f32 %v1489_v43, %v1297_v53  ;;  %v462_v60 = vpop.f32.mrb[38].mxu0 }
 0x158   : > { %v1588_v61 = vadd.f32 %v1587_v45, %v1299_v57  ;;  %v1034_v62 = vadd.f32 %v1033_v46, %v462_v60  ;;  %v1300_v63 = vmul.f32 %v462_v60, %v462_v60  ;;  %v827_v0 = vpop.f32.mrb[38].mxu1  ;;  %v464_v1 = vpop.f32.mrb[39].mxu0 }
 0x159   : > { %v1132_v2 = vadd.f32 %v1131_v50, %v827_v0  ;;  %v1302_v3 = vmul.f32 %v827_v0, %v827_v0  ;;  %v1083_v4 = vadd.f32 %v1082_v52, %v464_v1  ;;  %v1301_v5 = vmul.f32 %v464_v1, %v464_v1  ;;  %v829_v6 = vpop.f32.mrb[39].mxu1 }
 0x15a   : > { %v1442_v7 = vadd.f32 %v1441_v55, %v1300_v63  ;;  %v1181_v9 = vadd.f32 %v1180_v56, %v829_v6  ;;  %v1303_v10 = vmul.f32 %v829_v6, %v829_v6 }
 0x15b   : > { %v1540_v11 = vadd.f32 %v1539_v58, %v1302_v3  ;;  %v1491_v12 = vadd.f32 %v1490_v59, %v1301_v5  ;;  %v468_v13 = vpop.f32.mrb[40].mxu0 }
 0x15c   : > { %v1589_v14 = vadd.f32 %v1588_v61, %v1303_v10  ;;  %v1035_v15 = vadd.f32 %v1034_v62, %v468_v13  ;;  %v1304_v16 = vmul.f32 %v468_v13, %v468_v13  ;;  %v833_v17 = vpop.f32.mrb[40].mxu1  ;;  %v470_v18 = vpop.f32.mrb[41].mxu0 }
 0x15d   : > { %v1133_v19 = vadd.f32 %v1132_v2, %v833_v17  ;;  %v1306_v20 = vmul.f32 %v833_v17, %v833_v17  ;;  %v1084_v21 = vadd.f32 %v1083_v4, %v470_v18  ;;  %v1305_v22 = vmul.f32 %v470_v18, %v470_v18  ;;  %v835_v23 = vpop.f32.mrb[41].mxu1 }
 0x15e   : > { %v1443_v24 = vadd.f32 %v1442_v7, %v1304_v16  ;;  %v1182_v25 = vadd.f32 %v1181_v9, %v835_v23  ;;  %v1307_v26 = vmul.f32 %v835_v23, %v835_v23 }
 0x15f   : > { %v1541_v27 = vadd.f32 %v1540_v11, %v1306_v20  ;;  %v1492_v28 = vadd.f32 %v1491_v12, %v1305_v22  ;;  %v474_v29 = vpop.f32.mrb[42].mxu0 }
 0x160   : > { %v1590_v30 = vadd.f32 %v1589_v14, %v1307_v26  ;;  %v1036_v31 = vadd.f32 %v1035_v15, %v474_v29  ;;  %v1308_v32 = vmul.f32 %v474_v29, %v474_v29  ;;  %v839_v33 = vpop.f32.mrb[42].mxu1  ;;  %v476_v34 = vpop.f32.mrb[43].mxu0 }
 0x161   : > { %v1134_v35 = vadd.f32 %v1133_v19, %v839_v33  ;;  %v1310_v36 = vmul.f32 %v839_v33, %v839_v33  ;;  %v1085_v37 = vadd.f32 %v1084_v21, %v476_v34  ;;  %v1309_v38 = vmul.f32 %v476_v34, %v476_v34  ;;  %v841_v8 = vpop.f32.mrb[43].mxu1 }
 0x162   : > { %v1444_v39 = vadd.f32 %v1443_v24, %v1308_v32  ;;  %v1183_v40 = vadd.f32 %v1182_v25, %v841_v8  ;;  %v1311_v41 = vmul.f32 %v841_v8, %v841_v8 }
 0x163   : > { %v1542_v42 = vadd.f32 %v1541_v27, %v1310_v36  ;;  %v1493_v43 = vadd.f32 %v1492_v28, %v1309_v38  ;;  %v480_v44 = vpop.f32.mrb[44].mxu0 }
 0x164   : > { %v1591_v45 = vadd.f32 %v1590_v30, %v1311_v41  ;;  %v1037_v46 = vadd.f32 %v1036_v31, %v480_v44  ;;  %v1312_v47 = vmul.f32 %v480_v44, %v480_v44  ;;  %v845_v48 = vpop.f32.mrb[44].mxu1  ;;  %v482_v49 = vpop.f32.mrb[45].mxu0 }
 0x165   : > { %v1135_v50 = vadd.f32 %v1134_v35, %v845_v48  ;;  %v1314_v51 = vmul.f32 %v845_v48, %v845_v48  ;;  %v1086_v52 = vadd.f32 %v1085_v37, %v482_v49  ;;  %v1313_v53 = vmul.f32 %v482_v49, %v482_v49  ;;  %v847_v54 = vpop.f32.mrb[45].mxu1 }
 0x166   : > { %v1445_v55 = vadd.f32 %v1444_v39, %v1312_v47  ;;  %v1184_v56 = vadd.f32 %v1183_v40, %v847_v54  ;;  %v1315_v57 = vmul.f32 %v847_v54, %v847_v54 }
 0x167   : > { %v1543_v58 = vadd.f32 %v1542_v42, %v1314_v51  ;;  %v1494_v59 = vadd.f32 %v1493_v43, %v1313_v53  ;;  %v486_v60 = vpop.f32.mrb[46].mxu0 }
 0x168   : > { %v1592_v61 = vadd.f32 %v1591_v45, %v1315_v57  ;;  %v1038_v62 = vadd.f32 %v1037_v46, %v486_v60  ;;  %v1316_v63 = vmul.f32 %v486_v60, %v486_v60  ;;  %v851_v0 = vpop.f32.mrb[46].mxu1  ;;  %v488_v1 = vpop.f32.mrb[47].mxu0 }
 0x169   : > { %v1136_v2 = vadd.f32 %v1135_v50, %v851_v0  ;;  %v1318_v3 = vmul.f32 %v851_v0, %v851_v0  ;;  %v1087_v4 = vadd.f32 %v1086_v52, %v488_v1  ;;  %v1317_v5 = vmul.f32 %v488_v1, %v488_v1  ;;  %v853_v6 = vpop.f32.mrb[47].mxu1 }
 0x16a   : > { %v1446_v7 = vadd.f32 %v1445_v55, %v1316_v63  ;;  %v1185_v9 = vadd.f32 %v1184_v56, %v853_v6  ;;  %v1319_v10 = vmul.f32 %v853_v6, %v853_v6 }
 0x16b   : > { %v1544_v11 = vadd.f32 %v1543_v58, %v1318_v3  ;;  %v1495_v12 = vadd.f32 %v1494_v59, %v1317_v5  ;;  %v492_v13 = vpop.f32.mrb[48].mxu0 }
 0x16c   : > { %v1593_v14 = vadd.f32 %v1592_v61, %v1319_v10  ;;  %v1039_v15 = vadd.f32 %v1038_v62, %v492_v13  ;;  %v1320_v16 = vmul.f32 %v492_v13, %v492_v13  ;;  %v857_v17 = vpop.f32.mrb[48].mxu1  ;;  %v494_v18 = vpop.f32.mrb[49].mxu0 }
 0x16d   : > { %v1137_v19 = vadd.f32 %v1136_v2, %v857_v17  ;;  %v1322_v20 = vmul.f32 %v857_v17, %v857_v17  ;;  %v1088_v21 = vadd.f32 %v1087_v4, %v494_v18  ;;  %v1321_v22 = vmul.f32 %v494_v18, %v494_v18  ;;  %v859_v23 = vpop.f32.mrb[49].mxu1 }
 0x16e   : > { %v1447_v24 = vadd.f32 %v1446_v7, %v1320_v16  ;;  %v1186_v25 = vadd.f32 %v1185_v9, %v859_v23  ;;  %v1323_v26 = vmul.f32 %v859_v23, %v859_v23 }
 0x16f   : > { %v1545_v27 = vadd.f32 %v1544_v11, %v1322_v20  ;;  %v1496_v28 = vadd.f32 %v1495_v12, %v1321_v22  ;;  %v498_v29 = vpop.f32.mrb[50].mxu0 }
 0x170   : > { %v1594_v30 = vadd.f32 %v1593_v14, %v1323_v26  ;;  %v1040_v31 = vadd.f32 %v1039_v15, %v498_v29  ;;  %v1324_v32 = vmul.f32 %v498_v29, %v498_v29  ;;  %v863_v33 = vpop.f32.mrb[50].mxu1  ;;  %v500_v34 = vpop.f32.mrb[51].mxu0 }
 0x171   : > { %v1138_v35 = vadd.f32 %v1137_v19, %v863_v33  ;;  %v1326_v36 = vmul.f32 %v863_v33, %v863_v33  ;;  %v1089_v37 = vadd.f32 %v1088_v21, %v500_v34  ;;  %v1325_v38 = vmul.f32 %v500_v34, %v500_v34  ;;  %v865_v8 = vpop.f32.mrb[51].mxu1 }
 0x172   : > { %v1448_v39 = vadd.f32 %v1447_v24, %v1324_v32  ;;  %v1187_v40 = vadd.f32 %v1186_v25, %v865_v8  ;;  %v1327_v41 = vmul.f32 %v865_v8, %v865_v8 }
 0x173   : > { %v1546_v42 = vadd.f32 %v1545_v27, %v1326_v36  ;;  %v1497_v43 = vadd.f32 %v1496_v28, %v1325_v38  ;;  %v504_v44 = vpop.f32.mrb[52].mxu0 }
 0x174   : > { %v1595_v45 = vadd.f32 %v1594_v30, %v1327_v41  ;;  %v1041_v46 = vadd.f32 %v1040_v31, %v504_v44  ;;  %v1328_v47 = vmul.f32 %v504_v44, %v504_v44  ;;  %v869_v48 = vpop.f32.mrb[52].mxu1  ;;  %v506_v49 = vpop.f32.mrb[53].mxu0 }
 0x175   : > { %v1139_v50 = vadd.f32 %v1138_v35, %v869_v48  ;;  %v1330_v51 = vmul.f32 %v869_v48, %v869_v48  ;;  %v1090_v52 = vadd.f32 %v1089_v37, %v506_v49  ;;  %v1329_v53 = vmul.f32 %v506_v49, %v506_v49  ;;  %v871_v54 = vpop.f32.mrb[53].mxu1 }
 0x176   : > { %v1449_v55 = vadd.f32 %v1448_v39, %v1328_v47  ;;  %v1188_v56 = vadd.f32 %v1187_v40, %v871_v54  ;;  %v1331_v57 = vmul.f32 %v871_v54, %v871_v54 }
 0x177   : > { %v1547_v58 = vadd.f32 %v1546_v42, %v1330_v51  ;;  %v1498_v59 = vadd.f32 %v1497_v43, %v1329_v53  ;;  %v510_v60 = vpop.f32.mrb[54].mxu0 }
 0x178   : > { %v1596_v61 = vadd.f32 %v1595_v45, %v1331_v57  ;;  %v1042_v62 = vadd.f32 %v1041_v46, %v510_v60  ;;  %v1332_v63 = vmul.f32 %v510_v60, %v510_v60  ;;  %v875_v0 = vpop.f32.mrb[54].mxu1  ;;  %v512_v1 = vpop.f32.mrb[55].mxu0 }
 0x179   : > { %v1140_v2 = vadd.f32 %v1139_v50, %v875_v0  ;;  %v1334_v3 = vmul.f32 %v875_v0, %v875_v0  ;;  %v1091_v4 = vadd.f32 %v1090_v52, %v512_v1  ;;  %v1333_v5 = vmul.f32 %v512_v1, %v512_v1  ;;  %v877_v6 = vpop.f32.mrb[55].mxu1 }
 0x17a   : > { %v1450_v7 = vadd.f32 %v1449_v55, %v1332_v63  ;;  %v1189_v9 = vadd.f32 %v1188_v56, %v877_v6  ;;  %v1335_v10 = vmul.f32 %v877_v6, %v877_v6 }
 0x17b   : > { %v1548_v11 = vadd.f32 %v1547_v58, %v1334_v3  ;;  %v1499_v12 = vadd.f32 %v1498_v59, %v1333_v5  ;;  %v516_v13 = vpop.f32.mrb[56].mxu0 }
 0x17c   : > { %v1597_v14 = vadd.f32 %v1596_v61, %v1335_v10  ;;  %v1043_v15 = vadd.f32 %v1042_v62, %v516_v13  ;;  %v1336_v16 = vmul.f32 %v516_v13, %v516_v13  ;;  %v881_v17 = vpop.f32.mrb[56].mxu1  ;;  %v518_v18 = vpop.f32.mrb[57].mxu0 }
 0x17d   : > { %v1141_v19 = vadd.f32 %v1140_v2, %v881_v17  ;;  %v1338_v20 = vmul.f32 %v881_v17, %v881_v17  ;;  %v1092_v21 = vadd.f32 %v1091_v4, %v518_v18  ;;  %v1337_v22 = vmul.f32 %v518_v18, %v518_v18  ;;  %v883_v23 = vpop.f32.mrb[57].mxu1 }
 0x17e   : > { %v1451_v24 = vadd.f32 %v1450_v7, %v1336_v16  ;;  %v1190_v25 = vadd.f32 %v1189_v9, %v883_v23  ;;  %v1339_v26 = vmul.f32 %v883_v23, %v883_v23 }
 0x17f   : > { %v1549_v27 = vadd.f32 %v1548_v11, %v1338_v20  ;;  %v1500_v28 = vadd.f32 %v1499_v12, %v1337_v22  ;;  %v522_v29 = vpop.f32.mrb[58].mxu0 }
 0x180   : > { %v1598_v30 = vadd.f32 %v1597_v14, %v1339_v26  ;;  %v1044_v31 = vadd.f32 %v1043_v15, %v522_v29  ;;  %v1340_v32 = vmul.f32 %v522_v29, %v522_v29  ;;  %v887_v33 = vpop.f32.mrb[58].mxu1  ;;  %v524_v34 = vpop.f32.mrb[59].mxu0 }
 0x181   : > { %v1142_v35 = vadd.f32 %v1141_v19, %v887_v33  ;;  %v1342_v36 = vmul.f32 %v887_v33, %v887_v33  ;;  %v1093_v37 = vadd.f32 %v1092_v21, %v524_v34  ;;  %v1341_v38 = vmul.f32 %v524_v34, %v524_v34  ;;  %v889_v8 = vpop.f32.mrb[59].mxu1 }
 0x182   : > { %v1452_v39 = vadd.f32 %v1451_v24, %v1340_v32  ;;  %v1191_v40 = vadd.f32 %v1190_v25, %v889_v8  ;;  %v1343_v41 = vmul.f32 %v889_v8, %v889_v8 }
 0x183   : > { %v1550_v42 = vadd.f32 %v1549_v27, %v1342_v36  ;;  %v1501_v43 = vadd.f32 %v1500_v28, %v1341_v38  ;;  %v528_v44 = vpop.f32.mrb[60].mxu0 }
 0x184   : > { %v1599_v45 = vadd.f32 %v1598_v30, %v1343_v41  ;;  %v1045_v46 = vadd.f32 %v1044_v31, %v528_v44  ;;  %v1344_v47 = vmul.f32 %v528_v44, %v528_v44  ;;  %v893_v48 = vpop.f32.mrb[60].mxu1  ;;  %v530_v49 = vpop.f32.mrb[61].mxu0 }
 0x185   : > { %v1143_v50 = vadd.f32 %v1142_v35, %v893_v48  ;;  %v1346_v51 = vmul.f32 %v893_v48, %v893_v48  ;;  %v1094_v52 = vadd.f32 %v1093_v37, %v530_v49  ;;  %v1345_v53 = vmul.f32 %v530_v49, %v530_v49  ;;  %v895_v54 = vpop.f32.mrb[61].mxu1 }
 0x186   : > { %v1453_v55 = vadd.f32 %v1452_v39, %v1344_v47  ;;  %v1192_v56 = vadd.f32 %v1191_v40, %v895_v54  ;;  %v1347_v57 = vmul.f32 %v895_v54, %v895_v54 }
 0x187   : > { %v1551_v58 = vadd.f32 %v1550_v42, %v1346_v51  ;;  %v1502_v59 = vadd.f32 %v1501_v43, %v1345_v53  ;;  %v534_v60 = vpop.f32.mrb[62].mxu0 }
 0x188   : > { %v1600_v61 = vadd.f32 %v1599_v45, %v1347_v57  ;;  %v1046_v62 = vadd.f32 %v1045_v46, %v534_v60  ;;  %v1348_v63 = vmul.f32 %v534_v60, %v534_v60  ;;  %v899_v0 = vpop.f32.mrb[62].mxu1  ;;  %v536_v1 = vpop.f32.mrb[63].mxu0 }
 0x189   : > { %v1144_v2 = vadd.f32 %v1143_v50, %v899_v0  ;;  %v1350_v3 = vmul.f32 %v899_v0, %v899_v0  ;;  %v1095_v4 = vadd.f32 %v1094_v52, %v536_v1  ;;  %v1349_v5 = vmul.f32 %v536_v1, %v536_v1  ;;  %v901_v6 = vpop.f32.mrb[63].mxu1 }
 0x18a   : > { %v1454_v7 = vadd.f32 %v1453_v55, %v1348_v63  ;;  %v1193_v9 = vadd.f32 %v1192_v56, %v901_v6  ;;  %v1351_v10 = vmul.f32 %v901_v6, %v901_v6 }
 0x18b   : > { %v1552_v11 = vadd.f32 %v1551_v58, %v1350_v3  ;;  %v1503_v12 = vadd.f32 %v1502_v59, %v1349_v5  ;;  %v540_v13 = vpop.f32.mrb[64].mxu0 }
 0x18c   : > { %v1601_v14 = vadd.f32 %v1600_v61, %v1351_v10  ;;  %v1047_v15 = vadd.f32 %v1046_v62, %v540_v13  ;;  %v1352_v16 = vmul.f32 %v540_v13, %v540_v13  ;;  %v905_v17 = vpop.f32.mrb[64].mxu1  ;;  %v542_v18 = vpop.f32.mrb[65].mxu0 }
 0x18d   : > { %v1145_v19 = vadd.f32 %v1144_v2, %v905_v17  ;;  %v1354_v20 = vmul.f32 %v905_v17, %v905_v17  ;;  %v1096_v21 = vadd.f32 %v1095_v4, %v542_v18  ;;  %v1353_v22 = vmul.f32 %v542_v18, %v542_v18  ;;  %v907_v23 = vpop.f32.mrb[65].mxu1 }
 0x18e   : > { %v1455_v24 = vadd.f32 %v1454_v7, %v1352_v16  ;;  %v1194_v25 = vadd.f32 %v1193_v9, %v907_v23  ;;  %v1355_v26 = vmul.f32 %v907_v23, %v907_v23 }
 0x18f   : > { %v1553_v27 = vadd.f32 %v1552_v11, %v1354_v20  ;;  %v1504_v28 = vadd.f32 %v1503_v12, %v1353_v22  ;;  %v546_v29 = vpop.f32.mrb[66].mxu0 }
 0x190   : > { %v1602_v30 = vadd.f32 %v1601_v14, %v1355_v26  ;;  %v1048_v31 = vadd.f32 %v1047_v15, %v546_v29  ;;  %v1356_v32 = vmul.f32 %v546_v29, %v546_v29  ;;  %v911_v33 = vpop.f32.mrb[66].mxu1  ;;  %v548_v34 = vpop.f32.mrb[67].mxu0 }
 0x191   : > { %v1146_v35 = vadd.f32 %v1145_v19, %v911_v33  ;;  %v1358_v36 = vmul.f32 %v911_v33, %v911_v33  ;;  %v1097_v37 = vadd.f32 %v1096_v21, %v548_v34  ;;  %v1357_v38 = vmul.f32 %v548_v34, %v548_v34  ;;  %v913_v8 = vpop.f32.mrb[67].mxu1 }
 0x192   : > { %v1456_v39 = vadd.f32 %v1455_v24, %v1356_v32  ;;  %v1195_v40 = vadd.f32 %v1194_v25, %v913_v8  ;;  %v1359_v41 = vmul.f32 %v913_v8, %v913_v8 }
 0x193   : > { %v1554_v42 = vadd.f32 %v1553_v27, %v1358_v36  ;;  %v1505_v43 = vadd.f32 %v1504_v28, %v1357_v38  ;;  %v552_v44 = vpop.f32.mrb[68].mxu0 }
 0x194   : > { %v1603_v45 = vadd.f32 %v1602_v30, %v1359_v41  ;;  %v1049_v46 = vadd.f32 %v1048_v31, %v552_v44  ;;  %v1360_v47 = vmul.f32 %v552_v44, %v552_v44  ;;  %v917_v48 = vpop.f32.mrb[68].mxu1  ;;  %v554_v49 = vpop.f32.mrb[69].mxu0 }
 0x195   : > { %v1147_v50 = vadd.f32 %v1146_v35, %v917_v48  ;;  %v1362_v51 = vmul.f32 %v917_v48, %v917_v48  ;;  %v1098_v52 = vadd.f32 %v1097_v37, %v554_v49  ;;  %v1361_v53 = vmul.f32 %v554_v49, %v554_v49  ;;  %v919_v54 = vpop.f32.mrb[69].mxu1 }
 0x196   : > { %v1457_v55 = vadd.f32 %v1456_v39, %v1360_v47  ;;  %v1196_v56 = vadd.f32 %v1195_v40, %v919_v54  ;;  %v1363_v57 = vmul.f32 %v919_v54, %v919_v54 }
 0x197   : > { %v1555_v58 = vadd.f32 %v1554_v42, %v1362_v51  ;;  %v1506_v59 = vadd.f32 %v1505_v43, %v1361_v53  ;;  %v558_v60 = vpop.f32.mrb[70].mxu0 }
 0x198   : > { %v1604_v61 = vadd.f32 %v1603_v45, %v1363_v57  ;;  %v1050_v62 = vadd.f32 %v1049_v46, %v558_v60  ;;  %v1364_v63 = vmul.f32 %v558_v60, %v558_v60  ;;  %v923_v0 = vpop.f32.mrb[70].mxu1  ;;  %v560_v1 = vpop.f32.mrb[71].mxu0 }
 0x199   : > { %v1148_v2 = vadd.f32 %v1147_v50, %v923_v0  ;;  %v1366_v3 = vmul.f32 %v923_v0, %v923_v0  ;;  %v1099_v4 = vadd.f32 %v1098_v52, %v560_v1  ;;  %v1365_v5 = vmul.f32 %v560_v1, %v560_v1  ;;  %v925_v6 = vpop.f32.mrb[71].mxu1 }
 0x19a   : > { %v1458_v7 = vadd.f32 %v1457_v55, %v1364_v63  ;;  %v1197_v9 = vadd.f32 %v1196_v56, %v925_v6  ;;  %v1367_v10 = vmul.f32 %v925_v6, %v925_v6 }
 0x19b   : > { %v1556_v11 = vadd.f32 %v1555_v58, %v1366_v3  ;;  %v1507_v12 = vadd.f32 %v1506_v59, %v1365_v5  ;;  %v564_v13 = vpop.f32.mrb[72].mxu0 }
 0x19c   : > { %v1605_v14 = vadd.f32 %v1604_v61, %v1367_v10  ;;  %v1051_v15 = vadd.f32 %v1050_v62, %v564_v13  ;;  %v1368_v16 = vmul.f32 %v564_v13, %v564_v13  ;;  %v929_v17 = vpop.f32.mrb[72].mxu1  ;;  %v566_v18 = vpop.f32.mrb[73].mxu0 }
 0x19d   : > { %v1149_v19 = vadd.f32 %v1148_v2, %v929_v17  ;;  %v1370_v20 = vmul.f32 %v929_v17, %v929_v17  ;;  %v1100_v21 = vadd.f32 %v1099_v4, %v566_v18  ;;  %v1369_v22 = vmul.f32 %v566_v18, %v566_v18  ;;  %v931_v23 = vpop.f32.mrb[73].mxu1 }
 0x19e   : > { %v1459_v24 = vadd.f32 %v1458_v7, %v1368_v16  ;;  %v1198_v25 = vadd.f32 %v1197_v9, %v931_v23  ;;  %v1371_v26 = vmul.f32 %v931_v23, %v931_v23 }
 0x19f   : > { %v1557_v27 = vadd.f32 %v1556_v11, %v1370_v20  ;;  %v1508_v28 = vadd.f32 %v1507_v12, %v1369_v22  ;;  %v570_v29 = vpop.f32.mrb[74].mxu0 }
 0x1a0   : > { %v1606_v30 = vadd.f32 %v1605_v14, %v1371_v26  ;;  %v1052_v31 = vadd.f32 %v1051_v15, %v570_v29  ;;  %v1372_v32 = vmul.f32 %v570_v29, %v570_v29  ;;  %v935_v33 = vpop.f32.mrb[74].mxu1  ;;  %v572_v34 = vpop.f32.mrb[75].mxu0 }
 0x1a1   : > { %v1150_v35 = vadd.f32 %v1149_v19, %v935_v33  ;;  %v1374_v36 = vmul.f32 %v935_v33, %v935_v33  ;;  %v1101_v37 = vadd.f32 %v1100_v21, %v572_v34  ;;  %v1373_v38 = vmul.f32 %v572_v34, %v572_v34  ;;  %v937_v8 = vpop.f32.mrb[75].mxu1 }
 0x1a2   : > { %v1460_v39 = vadd.f32 %v1459_v24, %v1372_v32  ;;  %v1199_v40 = vadd.f32 %v1198_v25, %v937_v8  ;;  %v1375_v41 = vmul.f32 %v937_v8, %v937_v8 }
 0x1a3   : > { %v1558_v42 = vadd.f32 %v1557_v27, %v1374_v36  ;;  %v1509_v43 = vadd.f32 %v1508_v28, %v1373_v38  ;;  %v576_v44 = vpop.f32.mrb[76].mxu0 }
 0x1a4   : > { %v1607_v45 = vadd.f32 %v1606_v30, %v1375_v41  ;;  %v1053_v46 = vadd.f32 %v1052_v31, %v576_v44  ;;  %v1376_v47 = vmul.f32 %v576_v44, %v576_v44  ;;  %v941_v48 = vpop.f32.mrb[76].mxu1  ;;  %v578_v49 = vpop.f32.mrb[77].mxu0 }
 0x1a5   : > { %v1151_v50 = vadd.f32 %v1150_v35, %v941_v48  ;;  %v1378_v51 = vmul.f32 %v941_v48, %v941_v48  ;;  %v1102_v52 = vadd.f32 %v1101_v37, %v578_v49  ;;  %v1377_v53 = vmul.f32 %v578_v49, %v578_v49  ;;  %v943_v54 = vpop.f32.mrb[77].mxu1 }
 0x1a6   : > { %v1461_v55 = vadd.f32 %v1460_v39, %v1376_v47  ;;  %v1200_v56 = vadd.f32 %v1199_v40, %v943_v54  ;;  %v1379_v57 = vmul.f32 %v943_v54, %v943_v54 }
 0x1a7   : > { %v1559_v58 = vadd.f32 %v1558_v42, %v1378_v51  ;;  %v1510_v59 = vadd.f32 %v1509_v43, %v1377_v53  ;;  %v582_v60 = vpop.f32.mrb[78].mxu0 }
 0x1a8   : > { %v1608_v61 = vadd.f32 %v1607_v45, %v1379_v57  ;;  %v1054_v62 = vadd.f32 %v1053_v46, %v582_v60  ;;  %v1380_v63 = vmul.f32 %v582_v60, %v582_v60  ;;  %v947_v0 = vpop.f32.mrb[78].mxu1  ;;  %v584_v1 = vpop.f32.mrb[79].mxu0 }
 0x1a9   : > { %v1152_v2 = vadd.f32 %v1151_v50, %v947_v0  ;;  %v1382_v3 = vmul.f32 %v947_v0, %v947_v0  ;;  %v1103_v4 = vadd.f32 %v1102_v52, %v584_v1  ;;  %v1381_v5 = vmul.f32 %v584_v1, %v584_v1  ;;  %v949_v6 = vpop.f32.mrb[79].mxu1 }
 0x1aa   : > { %v1462_v7 = vadd.f32 %v1461_v55, %v1380_v63  ;;  %v1201_v9 = vadd.f32 %v1200_v56, %v949_v6  ;;  %v1383_v10 = vmul.f32 %v949_v6, %v949_v6 }
 0x1ab   : > { %v1560_v11 = vadd.f32 %v1559_v58, %v1382_v3  ;;  %v1511_v12 = vadd.f32 %v1510_v59, %v1381_v5  ;;  %v588_v13 = vpop.f32.mrb[80].mxu0 }
 0x1ac   : > { %v1609_v14 = vadd.f32 %v1608_v61, %v1383_v10  ;;  %v1055_v15 = vadd.f32 %v1054_v62, %v588_v13  ;;  %v1384_v16 = vmul.f32 %v588_v13, %v588_v13  ;;  %v953_v17 = vpop.f32.mrb[80].mxu1  ;;  %v590_v18 = vpop.f32.mrb[81].mxu0 }
 0x1ad   : > { %v1153_v19 = vadd.f32 %v1152_v2, %v953_v17  ;;  %v1386_v20 = vmul.f32 %v953_v17, %v953_v17  ;;  %v1104_v21 = vadd.f32 %v1103_v4, %v590_v18  ;;  %v1385_v22 = vmul.f32 %v590_v18, %v590_v18  ;;  %v955_v23 = vpop.f32.mrb[81].mxu1 }
 0x1ae   : > { %v1463_v24 = vadd.f32 %v1462_v7, %v1384_v16  ;;  %v1202_v25 = vadd.f32 %v1201_v9, %v955_v23  ;;  %v1387_v26 = vmul.f32 %v955_v23, %v955_v23 }
 0x1af   : > { %v1561_v27 = vadd.f32 %v1560_v11, %v1386_v20  ;;  %v1512_v28 = vadd.f32 %v1511_v12, %v1385_v22  ;;  %v594_v29 = vpop.f32.mrb[82].mxu0 }
 0x1b0   : > { %v1610_v30 = vadd.f32 %v1609_v14, %v1387_v26  ;;  %v1056_v31 = vadd.f32 %v1055_v15, %v594_v29  ;;  %v1388_v32 = vmul.f32 %v594_v29, %v594_v29  ;;  %v959_v33 = vpop.f32.mrb[82].mxu1  ;;  %v596_v34 = vpop.f32.mrb[83].mxu0 }
 0x1b1   : > { %v1154_v35 = vadd.f32 %v1153_v19, %v959_v33  ;;  %v1390_v36 = vmul.f32 %v959_v33, %v959_v33  ;;  %v1105_v37 = vadd.f32 %v1104_v21, %v596_v34  ;;  %v1389_v38 = vmul.f32 %v596_v34, %v596_v34  ;;  %v961_v8 = vpop.f32.mrb[83].mxu1 }
 0x1b2   : > { %v1464_v39 = vadd.f32 %v1463_v24, %v1388_v32  ;;  %v1203_v40 = vadd.f32 %v1202_v25, %v961_v8  ;;  %v1391_v41 = vmul.f32 %v961_v8, %v961_v8 }
 0x1b3   : > { %v1562_v42 = vadd.f32 %v1561_v27, %v1390_v36  ;;  %v1513_v43 = vadd.f32 %v1512_v28, %v1389_v38  ;;  %v600_v44 = vpop.f32.mrb[84].mxu0 }
 0x1b4   : > { %v1611_v45 = vadd.f32 %v1610_v30, %v1391_v41  ;;  %v1057_v46 = vadd.f32 %v1056_v31, %v600_v44  ;;  %v1392_v47 = vmul.f32 %v600_v44, %v600_v44  ;;  %v965_v48 = vpop.f32.mrb[84].mxu1  ;;  %v602_v49 = vpop.f32.mrb[85].mxu0 }
 0x1b5   : > { %v1155_v50 = vadd.f32 %v1154_v35, %v965_v48  ;;  %v1394_v51 = vmul.f32 %v965_v48, %v965_v48  ;;  %v1106_v52 = vadd.f32 %v1105_v37, %v602_v49  ;;  %v1393_v53 = vmul.f32 %v602_v49, %v602_v49  ;;  %v967_v54 = vpop.f32.mrb[85].mxu1 }
 0x1b6   : > { %v1465_v55 = vadd.f32 %v1464_v39, %v1392_v47  ;;  %v1204_v56 = vadd.f32 %v1203_v40, %v967_v54  ;;  %v1395_v57 = vmul.f32 %v967_v54, %v967_v54 }
 0x1b7   : > { %v1563_v58 = vadd.f32 %v1562_v42, %v1394_v51  ;;  %v1514_v59 = vadd.f32 %v1513_v43, %v1393_v53  ;;  %v606_v60 = vpop.f32.mrb[86].mxu0 }
 0x1b8   : > { %v1612_v61 = vadd.f32 %v1611_v45, %v1395_v57  ;;  %v1058_v62 = vadd.f32 %v1057_v46, %v606_v60  ;;  %v1396_v63 = vmul.f32 %v606_v60, %v606_v60  ;;  %v971_v0 = vpop.f32.mrb[86].mxu1  ;;  %v608_v1 = vpop.f32.mrb[87].mxu0 }
 0x1b9   : > { %v1156_v2 = vadd.f32 %v1155_v50, %v971_v0  ;;  %v1398_v3 = vmul.f32 %v971_v0, %v971_v0  ;;  %v1107_v4 = vadd.f32 %v1106_v52, %v608_v1  ;;  %v1397_v5 = vmul.f32 %v608_v1, %v608_v1  ;;  %v973_v6 = vpop.f32.mrb[87].mxu1 }
 0x1ba   : > { %v1466_v7 = vadd.f32 %v1465_v55, %v1396_v63  ;;  %v1205_v9 = vadd.f32 %v1204_v56, %v973_v6  ;;  %v1399_v10 = vmul.f32 %v973_v6, %v973_v6 }
 0x1bb   : > { %v1564_v11 = vadd.f32 %v1563_v58, %v1398_v3  ;;  %v1515_v12 = vadd.f32 %v1514_v59, %v1397_v5  ;;  %v612_v13 = vpop.f32.mrb[88].mxu0 }
 0x1bc   : > { %v1613_v14 = vadd.f32 %v1612_v61, %v1399_v10  ;;  %v1059_v15 = vadd.f32 %v1058_v62, %v612_v13  ;;  %v1400_v16 = vmul.f32 %v612_v13, %v612_v13  ;;  %v977_v17 = vpop.f32.mrb[88].mxu1  ;;  %v614_v18 = vpop.f32.mrb[89].mxu0 }
 0x1bd   : > { %v1157_v19 = vadd.f32 %v1156_v2, %v977_v17  ;;  %v1402_v20 = vmul.f32 %v977_v17, %v977_v17  ;;  %v1108_v21 = vadd.f32 %v1107_v4, %v614_v18  ;;  %v1401_v22 = vmul.f32 %v614_v18, %v614_v18  ;;  %v979_v23 = vpop.f32.mrb[89].mxu1 }
 0x1be   : > { %v1467_v24 = vadd.f32 %v1466_v7, %v1400_v16  ;;  %v1206_v25 = vadd.f32 %v1205_v9, %v979_v23  ;;  %v1403_v26 = vmul.f32 %v979_v23, %v979_v23 }
 0x1bf   : > { %v1565_v27 = vadd.f32 %v1564_v11, %v1402_v20  ;;  %v1516_v28 = vadd.f32 %v1515_v12, %v1401_v22  ;;  %v618_v29 = vpop.f32.mrb[90].mxu0 }
 0x1c0   : > { %v1614_v30 = vadd.f32 %v1613_v14, %v1403_v26  ;;  %v1060_v31 = vadd.f32 %v1059_v15, %v618_v29  ;;  %v1404_v32 = vmul.f32 %v618_v29, %v618_v29  ;;  %v983_v33 = vpop.f32.mrb[90].mxu1  ;;  %v620_v34 = vpop.f32.mrb[91].mxu0 }
 0x1c1   : > { %v1158_v35 = vadd.f32 %v1157_v19, %v983_v33  ;;  %v1406_v36 = vmul.f32 %v983_v33, %v983_v33  ;;  %v1109_v37 = vadd.f32 %v1108_v21, %v620_v34  ;;  %v1405_v38 = vmul.f32 %v620_v34, %v620_v34  ;;  %v985_v8 = vpop.f32.mrb[91].mxu1 }
 0x1c2   : > { %v1468_v39 = vadd.f32 %v1467_v24, %v1404_v32  ;;  %v1207_v40 = vadd.f32 %v1206_v25, %v985_v8  ;;  %v1407_v41 = vmul.f32 %v985_v8, %v985_v8 }
 0x1c3   : > { %v1566_v42 = vadd.f32 %v1565_v27, %v1406_v36  ;;  %v1517_v43 = vadd.f32 %v1516_v28, %v1405_v38  ;;  %v624_v44 = vpop.f32.mrb[92].mxu0  ;;  %v1220_v38 = vld [vmem:[%s2303_s3] sm:$0xff] }
 0x1c4   : > { %v1615_v45 = vadd.f32 %v1614_v30, %v1407_v41  ;;  %v1061_v46 = vadd.f32 %v1060_v31, %v624_v44  ;;  %v1408_v47 = vmul.f32 %v624_v44, %v624_v44  ;;  %v989_v48 = vpop.f32.mrb[92].mxu1  ;;  %v626_v49 = vpop.f32.mrb[93].mxu0  ;;  %v1012_v30 = vld [vmem:[%s2302_s2] sm:$0xff] }
 0x1c5   : > { %v1159_v50 = vadd.f32 %v1158_v35, %v989_v48  ;;  %v1410_v51 = vmul.f32 %v989_v48, %v989_v48  ;;  %v1110_v52 = vadd.f32 %v1109_v37, %v626_v49  ;;  %v1409_v53 = vmul.f32 %v626_v49, %v626_v49  ;;  %v991_v54 = vpop.f32.mrb[93].mxu1  ;;  %v1014_v35 = vld [vmem:[%s2302_s2 + $0x10] sm:$0xff]  ;;  %v1013_v37 = vld [vmem:[%s2302_s2 + $0x8] sm:$0xff] }
 0x1c6   : > { %v1469_v55 = vadd.f32 %v1468_v39, %v1408_v47  ;;  %v1208_v56 = vadd.f32 %v1207_v40, %v991_v54  ;;  %v1411_v57 = vmul.f32 %v991_v54, %v991_v54  ;;  %v1221_v47 = vld [vmem:[%s2303_s3 + $0x8] sm:$0xff]  ;;  %v1223_v54 = vld [vmem:[%s2303_s3 + $0x18] sm:$0xff] }
 0x1c7   : > { %v1567_v58 = vadd.f32 %v1566_v42, %v1410_v51  ;;  %v1518_v59 = vadd.f32 %v1517_v43, %v1409_v53  ;;  %v630_v60 = vpop.f32.mrb[94].mxu0  ;;  %v1015_v43 = vld [vmem:[%s2302_s2 + $0x18] sm:$0xff] }
 0x1c8   : > { %v1616_v61 = vadd.f32 %v1615_v45, %v1411_v57  ;;  %v1062_v62 = vadd.f32 %v1061_v46, %v630_v60  ;;  %v1412_v63 = vmul.f32 %v630_v60, %v630_v60  ;;  %v995_v0 = vpop.f32.mrb[94].mxu1  ;;  %v632_v1 = vpop.f32.mrb[95].mxu0  ;;  %v1222_v46 = vld [vmem:[%s2303_s3 + $0x10] sm:$0xff] }
 0x1c9   : > { %v1160_v2 = vadd.f32 %v1159_v50, %v995_v0  ;;  %v1414_v3 = vmul.f32 %v995_v0, %v995_v0  ;;  %v1111_v4 = vadd.f32 %v1110_v52, %v632_v1  ;;  %v1413_v5 = vmul.f32 %v632_v1, %v632_v1  ;;  %v997_v6 = vpop.f32.mrb[95].mxu1 }
 0x1ca   : > { %v1470_v7 = vadd.f32 %v1469_v55, %v1412_v63  ;;  %v1209_v9 = vadd.f32 %v1208_v56, %v997_v6  ;;  %v1415_v10 = vmul.f32 %v997_v6, %v997_v6 }
 0x1cb   : > { %v1568_v11 = vadd.f32 %v1567_v58, %v1414_v3  ;;  %v1519_v12 = vadd.f32 %v1518_v59, %v1413_v5  ;;  %v636_v13 = vpop.f32.mrb[96].mxu0 }
 0x1cc   : > { %v1617_v14 = vadd.f32 %v1616_v61, %v1415_v10  ;;  %v1063_v15 = vadd.f32 %v1062_v62, %v636_v13  ;;  %v1416_v16 = vmul.f32 %v636_v13, %v636_v13  ;;  %v1001_v17 = vpop.f32.mrb[96].mxu1  ;;  %v638_v18 = vpop.f32.mrb[97].mxu0 }
 0x1cd   : > { %v1161_v19 = vadd.f32 %v1160_v2, %v1001_v17  ;;  %v1418_v20 = vmul.f32 %v1001_v17, %v1001_v17  ;;  %v1112_v21 = vadd.f32 %v1111_v4, %v638_v18  ;;  %v1417_v22 = vmul.f32 %v638_v18, %v638_v18  ;;  %v1003_v23 = vpop.f32.mrb[97].mxu1 }
 0x1ce   : > { %v1471_v24 = vadd.f32 %v1470_v7, %v1416_v16  ;;  %v1210_v25 = vadd.f32 %v1209_v9, %v1003_v23  ;;  %v1419_v26 = vmul.f32 %v1003_v23, %v1003_v23 }
 0x1cf   : > { %v1569_v27 = vadd.f32 %v1568_v11, %v1418_v20  ;;  %v1520_v28 = vadd.f32 %v1519_v12, %v1417_v22  ;;  %v642_v29 = vpop.f32.mrb[98].mxu0 }
 0x1d0   : > { %v1618_v31 = vadd.f32 %v1617_v14, %v1419_v26  ;;  %v1064_v32 = vadd.f32 %v1063_v15, %v642_v29  ;;  %v1420_v33 = vmul.f32 %v642_v29, %v642_v29  ;;  %v1007_v34 = vpop.f32.mrb[98].mxu1  ;;  %v644_v36 = vpop.f32.mrb[99].mxu0 }
 0x1d1   : > { %v1162_v8 = vadd.f32 %v1161_v19, %v1007_v34  ;;  %v1422_v39 = vmul.f32 %v1007_v34, %v1007_v34  ;;  %v1113_v40 = vadd.f32 %v1112_v21, %v644_v36  ;;  %v1421_v41 = vmul.f32 %v644_v36, %v644_v36  ;;  %v1009_v42 = vpop.f32.mrb[99].mxu1 }
 0x1d2   : > { %v1212_v44 = vadd.f32 %v1064_v32, %v1012_v30  ;;  %v1472_v45 = vadd.f32 %v1471_v24, %v1420_v33  ;;  %v1211_v48 = vadd.f32 %v1210_v25, %v1009_v42  ;;  %v1423_v49 = vmul.f32 %v1009_v42, %v1009_v42  ;;  %1631 = sbr.rel (%p1710_p5) target bundleno = 489 (0x1e9), region = 36 }
 0x1d3   : > { %v1214_v50 = vadd.f32 %v1162_v8, %v1014_v35  ;;  %v1570_v51 = vadd.f32 %v1569_v27, %v1422_v39  ;;  %v1213_v52 = vadd.f32 %v1113_v40, %v1013_v37  ;;  %v1521_v53 = vadd.f32 %v1520_v28, %v1421_v41 }
 0x1d4   : > { %1216 = vst [vmem:[%s2302_s2] sm:$0xff] %v1212_v44  ;;  %v1620_v55 = vadd.f32 %v1472_v45, %v1220_v38  ;;  %v1215_v56 = vadd.f32 %v1211_v48, %v1015_v43  ;;  %v1619_v57 = vadd.f32 %v1618_v31, %v1423_v49 }
 0x1d5   : > { %1218 = vst [vmem:[%s2302_s2 + $0x10] sm:$0xff] %v1214_v50  ;;  %v1622_v58 = vadd.f32 %v1570_v51, %v1222_v46  ;;  %1217 = vst [vmem:[%s2302_s2 + $0x8] sm:$0xff] %v1213_v52  ;;  %v1621_v59 = vadd.f32 %v1521_v53, %v1221_v47 }
 0x1d6   : > { %1624 = vst [vmem:[%s2303_s3] sm:$0xff] %v1620_v55  ;;  %1219 = vst [vmem:[%s2302_s2 + $0x18] sm:$0xff] %v1215_v56  ;;  %v1623_v60 = vadd.f32 %v1619_v57, %v1223_v54 }
 0x1d7   : > { %1626 = vst [vmem:[%s2303_s3 + $0x10] sm:$0xff] %v1622_v58  ;;  %1625 = vst [vmem:[%s2303_s3 + $0x8] sm:$0xff] %v1621_v59 }
 0x1d8   : > { %1627 = vst [vmem:[%s2303_s3 + $0x18] sm:$0xff] %v1623_v60 }
 0x1db   : > { %v1632_v61 = vld [vmem:[%s2302_s2] sm:$0xff] }
 0x1dc   : > { %v1633_v62 = vld [vmem:[%s2302_s2 + $0x8] sm:$0xff]  ;;  %v1634_v63 = vld [vmem:[%s2302_s2 + $0x10] sm:$0xff]  ;;  %v1637_v0 = vmul.f32 0.01, %v1632_v61 }
 0x1dd   : > { %v1638_v1 = vmul.f32 0.01, %v1633_v62  ;;  %v1639_v2 = vmul.f32 0.01, %v1634_v63  ;;  %v1635_v3 = vld [vmem:[%s2302_s2 + $0x18] sm:$0xff]  ;;  %v1645_v4 = vld [vmem:[%s2303_s3] sm:$0xff] }
 0x1de   : > { %v1646_v5 = vld [vmem:[%s2303_s3 + $0x8] sm:$0xff]  ;;  %1641 = vst [vmem:[%s2302_s2] sm:$0xff] %v1637_v0  ;;  %v1640_v6 = vmul.f32 0.01, %v1635_v3  ;;  %v1649_v7 = vmul.f32 %v1637_v0, %v1632_v61  ;;  %v1647_v10 = vld [vmem:[%s2303_s3 + $0x10] sm:$0xff] }
 0x1df   : > { %1642 = vst [vmem:[%s2302_s2 + $0x8] sm:$0xff] %v1638_v1  ;;  %1643 = vst [vmem:[%s2302_s2 + $0x10] sm:$0xff] %v1639_v2  ;;  %v1650_v9 = vmul.f32 %v1638_v1, %v1633_v62  ;;  %v1651_v11 = vmul.f32 %v1639_v2, %v1634_v63  ;;  %v1648_v12 = vld [vmem:[%s2303_s3 + $0x18] sm:$0xff] }
 0x1e0   : > { %1644 = vst [vmem:[%s2302_s2 + $0x18] sm:$0xff] %v1640_v6  ;;  %v1653_v13 = vsub.f32 %v1645_v4, %v1649_v7  ;;  %v1652_v16 = vmul.f32 %v1640_v6, %v1635_v3 }
 0x1e1   : > { %v1654_v14 = vsub.f32 %v1646_v5, %v1650_v9  ;;  %v1655_v15 = vsub.f32 %v1647_v10, %v1651_v11 }
 0x1e2   : > { %v1658_v17 = vmul.f32 0.01010101, %v1653_v13  ;;  %v1656_v20 = vsub.f32 %v1648_v12, %v1652_v16 }
 0x1e3   : > { %v1659_v18 = vmul.f32 0.01010101, %v1654_v14  ;;  %v1660_v19 = vmul.f32 0.01010101, %v1655_v15 }
 0x1e4   : > { %v1662_v21 = vmax.f32 %v1658_v17, 0.0  ;;  %v1661_v24 = vmul.f32 0.01010101, %v1656_v20 }
 0x1e5   : > { %v1663_v22 = vmax.f32 %v1659_v18, 0.0  ;;  %v1664_v23 = vmax.f32 %v1660_v19, 0.0 }
 0x1e6   : > { %1666 = vst [vmem:[%s2303_s3] sm:$0xff] %v1662_v21  ;;  %v1665_v25 = vmax.f32 %v1661_v24, 0.0 }
 0x1e7   : > { %1667 = vst [vmem:[%s2303_s3 + $0x8] sm:$0xff] %v1663_v22  ;;  %1668 = vst [vmem:[%s2303_s3 + $0x10] sm:$0xff] %v1664_v23 }
 0x1e8   : > { %1669 = vst [vmem:[%s2303_s3 + $0x18] sm:$0xff] %v1665_v25 }
 0x1e9 PF: > { %s14_s12 = sadd.s32 1, %s1793_s12  }
 0x1ea   : > { %p11_p6 = scmp.ge.s32.totalorder %s14_s12, 4  }
 0x1ec   :  { %13 = sbr.rel (!%p11_p6) target bundleno = 1 (0x1), region = 70 }

</bundles_post_ra>
